<compile_context>
chip_gen: v7x
topology: tpu7x:2x2x1
jax: 0.10.0
libtpu: 0.0.40
codegen_flags: <defaults>
</compile_context>

<pallas_src>
import math
import functools

import jax
import jax.numpy as jnp
from jax.experimental import pallas as pl
from jax.experimental.pallas import tpu as pltpu


# ---------------------------------------------------------------------------
# In-kernel helpers
# ---------------------------------------------------------------------------
def _layer_norm(x, w, b, eps=1e-5):
    # PyTorch LayerNorm semantics: fp32 compute, biased variance.
    xf = x.astype(jnp.float32)
    mu = jnp.mean(xf, axis=-1, keepdims=True)
    var = jnp.mean((xf - mu) ** 2, axis=-1, keepdims=True)
    return (xf - mu) * jax.lax.rsqrt(var + eps) * w + b


# ---------------------------------------------------------------------------
# Fused ViT kernel: grid (batch_tiles, layers); activations carried in VMEM
# ---------------------------------------------------------------------------
def vit_kernel(patch_ref, convw_ref, cls_ref, pos_ref, lnpre_ref, vec_ref,
               wqkv_ref, wo_ref, wfc_ref, wpr_ref, lnpost_ref, proj_ref,
               out_ref, aw_ref, carry, *, n_head, seq_len):
    l = pl.program_id(1)
    n_layer = pl.num_programs(1)

    Bt, Lp, D = carry.shape
    M = Bt * Lp
    hd = D // n_head
    P = patch_ref.shape[1]

    # ---- l == 0: patch embedding (conv-as-matmul) + cls + pos emb + ln_pre ------
    @pl.when(l == 0)
    def _():
        lnw = lnpre_ref[0:1, :]
        lnb = lnpre_ref[1:2, :]
        pos = pos_ref[...]                                        # (Lp, D), padded rows 0
        pad_rows = Lp - 1 - P
        for bi in range(Bt):
            pw = jnp.dot(patch_ref[bi].astype(jnp.bfloat16), convw_ref[...],
                         preferred_element_type=jnp.float32)      # (P, D)
            rows = [cls_ref[...], pw]
            if pad_rows > 0:
                rows.append(jnp.zeros((pad_rows, D), jnp.float32))
            tok = jnp.concatenate(rows, axis=0) + pos             # (Lp, D)
            carry[bi] = _layer_norm(tok, lnw, lnb)                # aligned (Lp, D) store

    x = carry[...].reshape(M, D)                                  # (Bt*Lp, D) f32

    # ---- unpack the per-layer small-vector pack (one DMA per layer) -------------
    vec = vec_ref[...]                                            # (8, 4D) f32
    ln1w = vec[0:1, :D]
    ln1b = vec[1:2, :D]
    ln2w = vec[2:3, :D]
    ln2b = vec[3:4, :D]
    bo = vec[4:5, :D]
    bpr = vec[5:6, :D]
    bqkv = vec[6:7, :3 * D]
    bfc = vec[7:8, :]

    # ---- multi-head self-attention ----------------------------------------------
    h = _layer_norm(x, ln1w, ln1b)
    # wqkv pre-transposed (D, 3D) with 1/sqrt(hd) folded into the q columns/bias.
    qkv = jnp.dot(h.astype(jnp.bfloat16), wqkv_ref[...],
                  preferred_element_type=jnp.float32) + bqkv      # (M, 3D)
    qkv3 = qkv.reshape(Bt, Lp, 3 * D)

    if Lp > seq_len:                                              # mask padded keys
        key_idx = jax.lax.broadcasted_iota(jnp.int32, (1, 1, Lp), 2)
        neg = jnp.where(key_idx >= seq_len, jnp.float32(-1e30), jnp.float32(0.0))
    else:
        neg = None

    ctx_heads = []
    aw_cls = jnp.zeros((Bt, 1, Lp), jnp.float32)
    for hh in range(n_head):                                      # static unrolled loop,
        q_h = qkv3[:, :, hh * hd:(hh + 1) * hd]                   # lane slices -> no XLU
        k_h = qkv3[:, :, D + hh * hd:D + (hh + 1) * hd]           # transposes of (L,H,hd)
        v_h = qkv3[:, :, 2 * D + hh * hd:2 * D + (hh + 1) * hd]
        s = jnp.einsum('bqd,bkd->bqk', q_h.astype(jnp.bfloat16),
                       k_h.astype(jnp.bfloat16),
                       preferred_element_type=jnp.float32)        # (Bt, Lp, Lp)
        if neg is not None:
            s = s + neg
        s = s - jnp.max(s, axis=-1, keepdims=True)
        e = jnp.exp(s)
        p = e / jnp.sum(e, axis=-1, keepdims=True)                # exact softmax
        o_h = jnp.einsum('bqk,bkd->bqd', p.astype(jnp.bfloat16),
                         v_h.astype(jnp.bfloat16),
                         preferred_element_type=jnp.float32)      # (Bt, Lp, hd)
        ctx_heads.append(o_h)
        aw_cls = aw_cls + p[:, 0:1, :]                            # cls-query row

    ctx = jnp.concatenate(ctx_heads, axis=-1).reshape(M, D)       # concat heads on lanes
    attn = jnp.dot(ctx.astype(jnp.bfloat16), wo_ref[...],
                   preferred_element_type=jnp.float32) + bo
    x = x + attn

    # ---- MLP ---------------------------------------------------------------------
    h2 = _layer_norm(x, ln2w, ln2b)
    f = jnp.dot(h2.astype(jnp.bfloat16), wfc_ref[...],
                preferred_element_type=jnp.float32) + bfc         # (M, 4D)
    f = f * jax.nn.sigmoid(1.702 * f)                             # QuickGELU (f32)
    f = jnp.dot(f.astype(jnp.bfloat16), wpr_ref[...],
                preferred_element_type=jnp.float32) + bpr         # (M, D)
    x_new = x + f
    carry[...] = x_new.reshape(Bt, Lp, D)

    # ---- l == last: ln_post + output projection + head-avg cls attention row -----
    @pl.when(l == n_layer - 1)
    def _():
        lnw = lnpost_ref[0:1, :]
        lnb = lnpost_ref[1:2, :]
        hpost = _layer_norm(x_new, lnw, lnb)
        out = jnp.dot(hpost.astype(jnp.bfloat16), proj_ref[...],
                      preferred_element_type=jnp.float32)         # (M, Od)
        out_ref[...] = out.reshape(Bt, Lp, -1)
        aw_ref[...] = aw_cls * (1.0 / n_head)                     # head-averaged weights


# ---------------------------------------------------------------------------
# pallas_call wrapper
# ---------------------------------------------------------------------------
def run_vit(patches, packed, n_head, *, seq_len, batch_tile):
    B, P, K = patches.shape
    Lp, D = packed["pos"].shape
    Od = packed["proj"].shape[1]
    n_layer = packed["wqkv"].shape[0]
    Bt = batch_tile
    assert B % Bt == 0

    def batch_idx(b, l):
        return (b, 0, 0)

    def layer_idx(b, l):
        return (l, 0, 0)

    def fixed2(b, l):
        return (0, 0)

    in_specs = [
        pl.BlockSpec((Bt, P, K), batch_idx),                    # patches (per batch tile)
        pl.BlockSpec(packed["conv_wt"].shape, fixed2),          # conv weight (once)
        pl.BlockSpec(packed["cls"].shape, fixed2),              # cls embedding
        pl.BlockSpec(packed["pos"].shape, fixed2),              # positional embedding
        pl.BlockSpec(packed["ln_pre"].shape, fixed2),           # ln_pre (w;b)
        pl.BlockSpec((None, 8, 4 * D), layer_idx),              # packed per-layer vectors
        pl.BlockSpec((None, D, 3 * D), layer_idx),              # wqkv
        pl.BlockSpec((None, D, D), layer_idx),                  # wo
        pl.BlockSpec((None, D, 4 * D), layer_idx),              # wfc
        pl.BlockSpec((None, 4 * D, D), layer_idx),              # wpr
        pl.BlockSpec(packed["ln_post"].shape, fixed2),          # ln_post (w;b)
        pl.BlockSpec(packed["proj"].shape, fixed2),             # output projection
    ]

    kern = functools.partial(vit_kernel, n_head=n_head, seq_len=seq_len)

    out, aw = pl.pallas_call(
        kern,
        out_shape=(jax.ShapeDtypeStruct((B, Lp, Od), jnp.float32),
                   jax.ShapeDtypeStruct((B, 1, Lp), jnp.float32)),
        grid_spec=pltpu.PrefetchScalarGridSpec(
            num_scalar_prefetch=0,
            grid=(B // Bt, n_layer),
            in_specs=in_specs,
            out_specs=(pl.BlockSpec((Bt, Lp, Od), batch_idx),
                       pl.BlockSpec((Bt, 1, Lp), batch_idx)),
            scratch_shapes=[pltpu.VMEM((Bt, Lp, D), jnp.float32)],
        ),
        compiler_params=pltpu.CompilerParams(
            dimension_semantics=("parallel", "arbitrary"),
            vmem_limit_bytes=48 * 1024 * 1024),
    )(patches, packed["conv_wt"], packed["cls"], packed["pos"], packed["ln_pre"],
      packed["vecs"], packed["wqkv"], packed["wo"], packed["wfc"], packed["wpr"],
      packed["ln_post"], packed["proj"])
    return out, aw


# ---------------------------------------------------------------------------
# Parameter init (deterministic, synthetic, PyTorch layouts)
# ---------------------------------------------------------------------------
def init_params(key, *, input_resolution, patch_size, width, layers, heads, output_dim):
    P = (input_resolution // patch_size) ** 2
    scale = width ** (-0.5)
    keys = list(jax.random.split(key, 4 + layers * 8))

    def nk():
        return keys.pop(0)

    params = {
        "conv_w": 0.02 * jax.random.normal(nk(), (width, 3, patch_size, patch_size), jnp.float32),
        "cls": scale * jax.random.normal(nk(), (1, width), jnp.float32),
        "pos": scale * jax.random.normal(nk(), (P + 1, width), jnp.float32),
        "ln_pre_w": jnp.ones((1, width), jnp.float32),
        "ln_pre_b": jnp.zeros((1, width), jnp.float32),
        "ln_post_w": jnp.ones((1, width), jnp.float32),
        "ln_post_b": jnp.zeros((1, width), jnp.float32),
        "proj": scale * jax.random.normal(nk(), (width, output_dim), jnp.float32),
        "blocks": [],
    }
    for _ in range(layers):
        blk = {
            "ln1w": jnp.ones((1, width), jnp.float32),
            "ln1b": jnp.zeros((1, width), jnp.float32),
            "wqkv": 0.02 * jax.random.normal(nk(), (3 * width, width), jnp.float32),
            "bqkv": 0.01 * jax.random.normal(nk(), (1, 3 * width), jnp.float32),
            "wo": 0.02 * jax.random.normal(nk(), (width, width), jnp.float32),
            "bo": 0.01 * jax.random.normal(nk(), (1, width), jnp.float32),
            "ln2w": jnp.ones((1, width), jnp.float32),
            "ln2b": jnp.zeros((1, width), jnp.float32),
            "wfc": 0.02 * jax.random.normal(nk(), (4 * width, width), jnp.float32),
            "bfc": 0.01 * jax.random.normal(nk(), (1, 4 * width), jnp.float32),
            "wpr": 0.02 * jax.random.normal(nk(), (width, 4 * width), jnp.float32),
            "bpr": 0.01 * jax.random.normal(nk(), (1, width), jnp.float32),
        }
        params["blocks"].append(blk)
    return params


def pack_params(params, heads):
    """Host-side packing: transpose weights to (K, N), stack per layer, cast to bf16,
    fold 1/sqrt(head_dim) into the q projection, pad the sequence length to a
    multiple of 8 and pack the eight small per-layer vectors into one array."""
    width = params["conv_w"].shape[0]
    hd = width // heads
    scale = 1.0 / math.sqrt(hd)
    blocks = params["blocks"]

    L = params["pos"].shape[0]
    Lp = ((L + 7) // 8) * 8

    def stack(fn):
        return jnp.stack([fn(b) for b in blocks], axis=0)

    qscale = jnp.concatenate([jnp.full((width,), scale, jnp.float32),
                              jnp.ones((2 * width,), jnp.float32)])
    wqkv = stack(lambda b: b["wqkv"].T) * qscale[None, None, :]     # (layers, D, 3D)
    bqkv = stack(lambda b: b["bqkv"]) * qscale[None, None, :]       # (layers, 1, 3D)

    def pad_row(v, n):
        return jnp.pad(v, ((0, 0), (0, 0), (0, n - v.shape[-1])))

    vecs = jnp.concatenate([
        pad_row(stack(lambda b: b["ln1w"]), 4 * width),
        pad_row(stack(lambda b: b["ln1b"]), 4 * width),
        pad_row(stack(lambda b: b["ln2w"]), 4 * width),
        pad_row(stack(lambda b: b["ln2b"]), 4 * width),
        pad_row(stack(lambda b: b["bo"]), 4 * width),
        pad_row(stack(lambda b: b["bpr"]), 4 * width),
        pad_row(bqkv, 4 * width),
        stack(lambda b: b["bfc"]),
    ], axis=1)                                                       # (layers, 8, 4D)

    pos = jnp.pad(params["pos"], ((0, Lp - L), (0, 0)))

    return {
        "conv_wt": params["conv_w"].reshape(width, -1).T.astype(jnp.bfloat16),  # (K, D)
        "cls": params["cls"],
        "pos": pos,                                                              # (Lp, D)
        "ln_pre": jnp.concatenate([params["ln_pre_w"], params["ln_pre_b"]], axis=0),
        "ln_post": jnp.concatenate([params["ln_post_w"], params["ln_post_b"]], axis=0),
        "proj": params["proj"].astype(jnp.bfloat16),
        "vecs": vecs,
        "wqkv": wqkv.astype(jnp.bfloat16),                       # (layers, D, 3D)
        "wo": stack(lambda b: b["wo"].T).astype(jnp.bfloat16),   # (layers, D, D)
        "wfc": stack(lambda b: b["wfc"].T).astype(jnp.bfloat16), # (layers, D, 4D)
        "wpr": stack(lambda b: b["wpr"].T).astype(jnp.bfloat16), # (layers, 4D, D)
    }


def _pick_batch_tile(B, preferred=8):
    bt = min(B, preferred)
    while B % bt:
        bt -= 1
    return bt


# ---------------------------------------------------------------------------
# Full forward pass (host glue + fused Pallas kernel)
# ---------------------------------------------------------------------------
def vision_transformer_forward(x, packed, *, patch_size, heads, batch_tile=None):
    B, C, H, W = x.shape
    Hp, Wp = H // patch_size, W // patch_size
    P = Hp * Wp
    L = P + 1

    if batch_tile is None:
        batch_tile = _pick_batch_tile(B)

    # conv2d(stride=kernel) == patch extraction (host reshape) + matmul (in kernel)
    xp = x.reshape(B, C, Hp, patch_size, Wp, patch_size)
    xp = xp.transpose(0, 2, 4, 1, 3, 5).reshape(B, P, C * patch_size * patch_size)

    out, aw = run_vit(xp, packed, heads, seq_len=L, batch_tile=batch_tile)
    # out: (B, Lp, Od), aw: (B, 1, Lp) -- Lp >= L, padded rows are sliced away here.

    out = out[:, :L, :].transpose(1, 0, 2)   # (L, B, output_dim) == permute(1, 0, 2)
    seq_tokens = out[1:]                     # (L-1, B, output_dim)
    cls_token = out[0]                       # (B, output_dim)
    attn_weight = aw[:, 0, 1:L]              # (B, L-1) last-layer cls->patch attention
    return seq_tokens, attn_weight, cls_token


# ---------------------------------------------------------------------------
if __name__ == "__main__":
    B, C, H, W = 2, 3, 16, 16
    patch_size = 8
    width, layers, heads, output_dim = 32, 2, 4, 16

    key = jax.random.PRNGKey(0)
    kx, kp = jax.random.split(key)
    x = jax.random.normal(kx, (B, C, H, W), jnp.float32)

    params = init_params(kp, input_resolution=H, patch_size=patch_size,
                         width=width, layers=layers, heads=heads, output_dim=output_dim)
    packed = pack_params(params, heads)

    seq_tokens, attn_weight, cls_token = vision_transformer_forward(
        x, packed, patch_size=patch_size, heads=heads)

    jax.block_until_ready((seq_tokens, attn_weight, cls_token))
    n_patches = (H // patch_size) ** 2
    assert seq_tokens.shape == (n_patches, B, output_dim)
    assert attn_weight.shape == (B, n_patches)
    assert cls_token.shape == (B, output_dim)
    print("KERNEL_OK")
</pallas_src>

<mosaic_0001>
module attributes {stable_mosaic.version = 11 : i64} {
  func.func @vit_kernel(%arg0: i32, %arg1: i32, %arg2: memref<2x4x192xf32, #tpu.memory_space<vmem>>, %arg3: memref<192x32xbf16, #tpu.memory_space<vmem>>, %arg4: memref<1x32xf32, #tpu.memory_space<vmem>>, %arg5: memref<8x32xf32, #tpu.memory_space<vmem>>, %arg6: memref<2x32xf32, #tpu.memory_space<vmem>>, %arg7: memref<1x8x128xf32, #tpu.memory_space<vmem>>, %arg8: memref<1x32x96xbf16, #tpu.memory_space<vmem>>, %arg9: memref<1x32x32xbf16, #tpu.memory_space<vmem>>, %arg10: memref<1x32x128xbf16, #tpu.memory_space<vmem>>, %arg11: memref<1x128x32xbf16, #tpu.memory_space<vmem>>, %arg12: memref<2x32xf32, #tpu.memory_space<vmem>>, %arg13: memref<32x16xbf16, #tpu.memory_space<vmem>>, %arg14: memref<2x8x16xf32, #tpu.memory_space<vmem>>, %arg15: memref<2x1x8xf32, #tpu.memory_space<vmem>>, %arg16: memref<2x8x32xf32, #tpu.memory_space<vmem>>) attributes {dimension_semantics = [#tpu.dimension_semantics<parallel>, #tpu.dimension_semantics<arbitrary>], iteration_bounds = array<i64: 1, 2>, scalar_prefetch = 0 : i64, scratch_operands = 1 : i64, tpu.core_type = #tpu.core_type<tc>, window_params = [{transform_indices = @transform_0, window_bounds = array<i64: 2, 4, 192>}, {pipeline_mode = #tpu.pipeline_mode<synchronous>, transform_indices = @transform_1, window_bounds = array<i64: 192, 32>}, {pipeline_mode = #tpu.pipeline_mode<synchronous>, transform_indices = @transform_2, window_bounds = array<i64: 1, 32>}, {pipeline_mode = #tpu.pipeline_mode<synchronous>, transform_indices = @transform_3, window_bounds = array<i64: 8, 32>}, {pipeline_mode = #tpu.pipeline_mode<synchronous>, transform_indices = @transform_4, window_bounds = array<i64: 2, 32>}, {transform_indices = @transform_5, window_bounds = array<i64: 1, 8, 128>}, {transform_indices = @transform_6, window_bounds = array<i64: 1, 32, 96>}, {transform_indices = @transform_7, window_bounds = array<i64: 1, 32, 32>}, {transform_indices = @transform_8, window_bounds = array<i64: 1, 32, 128>}, {transform_indices = @transform_9, window_bounds = array<i64: 1, 128, 32>}, {pipeline_mode = #tpu.pipeline_mode<synchronous>, transform_indices = @transform_10, window_bounds = array<i64: 2, 32>}, {pipeline_mode = #tpu.pipeline_mode<synchronous>, transform_indices = @transform_11, window_bounds = array<i64: 32, 16>}, {transform_indices = @transform_12, window_bounds = array<i64: 2, 8, 16>}, {transform_indices = @transform_13, window_bounds = array<i64: 2, 1, 8>}]} {
    %c0_i32 = arith.constant 0 : i32
    %0 = arith.cmpi eq, %arg1, %c0_i32 : i32
    %1 = arith.extui %0 : i1 to i32
    %c0_i32_0 = arith.constant 0 : i32
    %2 = arith.cmpi ne, %1, %c0_i32_0 : i32
    scf.if %2 {
      %c0_56 = arith.constant 0 : index
      %c0_57 = arith.constant 0 : index
      %196 = vector.load %arg6[%c0_56, %c0_57] : memref<2x32xf32, #tpu.memory_space<vmem>>, vector<1x32xf32>
      %c1 = arith.constant 1 : index
      %c0_58 = arith.constant 0 : index
      %197 = vector.load %arg6[%c1, %c0_58] : memref<2x32xf32, #tpu.memory_space<vmem>>, vector<1x32xf32>
      %c0_59 = arith.constant 0 : index
      %c0_60 = arith.constant 0 : index
      %198 = vector.load %arg5[%c0_59, %c0_60] : memref<8x32xf32, #tpu.memory_space<vmem>>, vector<8x32xf32>
      %c0_61 = arith.constant 0 : index
      %c0_62 = arith.constant 0 : index
      %c0_63 = arith.constant 0 : index
      %199 = vector.load %arg2[%c0_61, %c0_62, %c0_63] : memref<2x4x192xf32, #tpu.memory_space<vmem>>, vector<1x4x192xf32>
      %200 = vector.shape_cast %199 : vector<1x4x192xf32> to vector<4x192xf32>
      %201 = arith.truncf %200 : vector<4x192xf32> to vector<4x192xbf16>
      %c0_64 = arith.constant 0 : index
      %c0_65 = arith.constant 0 : index
      %202 = vector.load %arg3[%c0_64, %c0_65] : memref<192x32xbf16, #tpu.memory_space<vmem>>, vector<192x32xbf16>
      %cst_66 = arith.constant dense<0.000000e+00> : vector<4x32xf32>
      %203 = tpu.matmul %201, %202, %cst_66 {dimension_numbers = #tpu.dot_dimension_numbers<[1], [0], [0], [1], [0, 0, 1, 1], [], []>} : vector<4x192xbf16>, vector<192x32xbf16>, vector<4x32xf32> -> vector<4x32xf32>
      %c0_67 = arith.constant 0 : index
      %c0_68 = arith.constant 0 : index
      %204 = vector.load %arg4[%c0_67, %c0_68] : memref<1x32xf32, #tpu.memory_space<vmem>>, vector<1x32xf32>
      %cst_69 = arith.constant 0.000000e+00 : f32
      %205 = vector.broadcast %cst_69 : f32 to vector<3x32xf32>
      %206 = tpu.concatenate %204, %203, %205 in 0 : vector<1x32xf32>, vector<4x32xf32>, vector<3x32xf32> -> vector<8x32xf32>
      %207 = arith.addf %206, %198 : vector<8x32xf32>
      %cst_70 = arith.constant dense<0.000000e+00> : vector<8xf32>
      %208 = vector.multi_reduction <add>, %207, %cst_70 [1] : vector<8x32xf32> to vector<8xf32>
      %209 = vector.shape_cast %208 : vector<8xf32> to vector<8x1xf32>
      %cst_71 = arith.constant 3.200000e+01 : f32
      %210 = vector.broadcast %cst_71 : f32 to vector<8x1xf32>
      %211 = arith.divf %209, %210 : vector<8x1xf32>
      %212 = vector.broadcast %211 : vector<8x1xf32> to vector<8x32xf32>
      %213 = arith.subf %207, %212 : vector<8x32xf32>
      %214 = arith.mulf %213, %213 : vector<8x32xf32>
      %cst_72 = arith.constant dense<0.000000e+00> : vector<8xf32>
      %215 = vector.multi_reduction <add>, %214, %cst_72 [1] : vector<8x32xf32> to vector<8xf32>
      %216 = vector.shape_cast %215 : vector<8xf32> to vector<8x1xf32>
      %cst_73 = arith.constant 3.200000e+01 : f32
      %217 = vector.broadcast %cst_73 : f32 to vector<8x1xf32>
      %218 = arith.divf %216, %217 : vector<8x1xf32>
      %219 = vector.broadcast %211 : vector<8x1xf32> to vector<8x32xf32>
      %220 = arith.subf %207, %219 : vector<8x32xf32>
      %cst_74 = arith.constant 9.99999974E-6 : f32
      %221 = vector.broadcast %cst_74 : f32 to vector<8x1xf32>
      %222 = arith.addf %218, %221 : vector<8x1xf32>
      %223 = math.rsqrt %222 : vector<8x1xf32>
      %224 = vector.broadcast %223 : vector<8x1xf32> to vector<8x32xf32>
      %225 = arith.mulf %220, %224 : vector<8x32xf32>
      %226 = vector.broadcast %196 : vector<1x32xf32> to vector<8x32xf32>
      %227 = arith.mulf %225, %226 : vector<8x32xf32>
      %228 = vector.broadcast %197 : vector<1x32xf32> to vector<8x32xf32>
      %229 = arith.addf %227, %228 : vector<8x32xf32>
      %c0_75 = arith.constant 0 : index
      %c0_76 = arith.constant 0 : index
      %c0_77 = arith.constant 0 : index
      %230 = vector.load %arg16[%c0_75, %c0_76, %c0_77] : memref<2x8x32xf32, #tpu.memory_space<vmem>>, vector<1x8x32xf32>
      %231 = vector.shape_cast %230 : vector<1x8x32xf32> to vector<8x32xf32>
      %232 = vector.shape_cast %229 : vector<8x32xf32> to vector<1x8x32xf32>
      tpu.vector_store %arg16[%c0_75, %c0_76, %c0_77], %232 {strides = array<i32>} : memref<2x8x32xf32, #tpu.memory_space<vmem>>, vector<1x8x32xf32>,
      %c1_78 = arith.constant 1 : index
      %c0_79 = arith.constant 0 : index
      %c0_80 = arith.constant 0 : index
      %233 = vector.load %arg2[%c1_78, %c0_79, %c0_80] : memref<2x4x192xf32, #tpu.memory_space<vmem>>, vector<1x4x192xf32>
      %234 = vector.shape_cast %233 : vector<1x4x192xf32> to vector<4x192xf32>
      %235 = arith.truncf %234 : vector<4x192xf32> to vector<4x192xbf16>
      %c0_81 = arith.constant 0 : index
      %c0_82 = arith.constant 0 : index
      %236 = vector.load %arg3[%c0_81, %c0_82] : memref<192x32xbf16, #tpu.memory_space<vmem>>, vector<192x32xbf16>
      %cst_83 = arith.constant dense<0.000000e+00> : vector<4x32xf32>
      %237 = tpu.matmul %235, %236, %cst_83 {dimension_numbers = #tpu.dot_dimension_numbers<[1], [0], [0], [1], [0, 0, 1, 1], [], []>} : vector<4x192xbf16>, vector<192x32xbf16>, vector<4x32xf32> -> vector<4x32xf32>
      %c0_84 = arith.constant 0 : index
      %c0_85 = arith.constant 0 : index
      %238 = vector.load %arg4[%c0_84, %c0_85] : memref<1x32xf32, #tpu.memory_space<vmem>>, vector<1x32xf32>
      %cst_86 = arith.constant 0.000000e+00 : f32
      %239 = vector.broadcast %cst_86 : f32 to vector<3x32xf32>
      %240 = tpu.concatenate %238, %237, %239 in 0 : vector<1x32xf32>, vector<4x32xf32>, vector<3x32xf32> -> vector<8x32xf32>
      %241 = arith.addf %240, %198 : vector<8x32xf32>
      %cst_87 = arith.constant dense<0.000000e+00> : vector<8xf32>
      %242 = vector.multi_reduction <add>, %241, %cst_87 [1] : vector<8x32xf32> to vector<8xf32>
      %243 = vector.shape_cast %242 : vector<8xf32> to vector<8x1xf32>
      %cst_88 = arith.constant 3.200000e+01 : f32
      %244 = vector.broadcast %cst_88 : f32 to vector<8x1xf32>
      %245 = arith.divf %243, %244 : vector<8x1xf32>
      %246 = vector.broadcast %245 : vector<8x1xf32> to vector<8x32xf32>
      %247 = arith.subf %241, %246 : vector<8x32xf32>
      %248 = arith.mulf %247, %247 : vector<8x32xf32>
      %cst_89 = arith.constant dense<0.000000e+00> : vector<8xf32>
      %249 = vector.multi_reduction <add>, %248, %cst_89 [1] : vector<8x32xf32> to vector<8xf32>
      %250 = vector.shape_cast %249 : vector<8xf32> to vector<8x1xf32>
      %cst_90 = arith.constant 3.200000e+01 : f32
      %251 = vector.broadcast %cst_90 : f32 to vector<8x1xf32>
      %252 = arith.divf %250, %251 : vector<8x1xf32>
      %253 = vector.broadcast %245 : vector<8x1xf32> to vector<8x32xf32>
      %254 = arith.subf %241, %253 : vector<8x32xf32>
      %cst_91 = arith.constant 9.99999974E-6 : f32
      %255 = vector.broadcast %cst_91 : f32 to vector<8x1xf32>
      %256 = arith.addf %252, %255 : vector<8x1xf32>
      %257 = math.rsqrt %256 : vector<8x1xf32>
      %258 = vector.broadcast %257 : vector<8x1xf32> to vector<8x32xf32>
      %259 = arith.mulf %254, %258 : vector<8x32xf32>
      %260 = vector.broadcast %196 : vector<1x32xf32> to vector<8x32xf32>
      %261 = arith.mulf %259, %260 : vector<8x32xf32>
      %262 = vector.broadcast %197 : vector<1x32xf32> to vector<8x32xf32>
      %263 = arith.addf %261, %262 : vector<8x32xf32>
      %c1_92 = arith.constant 1 : index
      %c0_93 = arith.constant 0 : index
      %c0_94 = arith.constant 0 : index
      %264 = vector.load %arg16[%c1_92, %c0_93, %c0_94] : memref<2x8x32xf32, #tpu.memory_space<vmem>>, vector<1x8x32xf32>
      %265 = vector.shape_cast %264 : vector<1x8x32xf32> to vector<8x32xf32>
      %266 = vector.shape_cast %263 : vector<8x32xf32> to vector<1x8x32xf32>
      tpu.vector_store %arg16[%c1_92, %c0_93, %c0_94], %266 {strides = array<i32>} : memref<2x8x32xf32, #tpu.memory_space<vmem>>, vector<1x8x32xf32>,
    } else {
    }
    %c0 = arith.constant 0 : index
    %c0_1 = arith.constant 0 : index
    %c0_2 = arith.constant 0 : index
    %3 = vector.load %arg16[%c0, %c0_1, %c0_2] : memref<2x8x32xf32, #tpu.memory_space<vmem>>, vector<2x8x32xf32>
    %4 = vector.shape_cast %3 : vector<2x8x32xf32> to vector<16x32xf32>
    %c0_3 = arith.constant 0 : index
    %c0_4 = arith.constant 0 : index
    %c0_5 = arith.constant 0 : index
    %5 = vector.load %arg7[%c0_3, %c0_4, %c0_5] : memref<1x8x128xf32, #tpu.memory_space<vmem>>, vector<1x8x128xf32>
    %6 = vector.shape_cast %5 : vector<1x8x128xf32> to vector<8x128xf32>
    %7 = vector.extract_strided_slice %6 {offsets = [0, 0], sizes = [1, 32], strides = [1, 1]} : vector<8x128xf32> to vector<1x32xf32>
    %8 = vector.extract_strided_slice %6 {offsets = [1, 0], sizes = [1, 32], strides = [1, 1]} : vector<8x128xf32> to vector<1x32xf32>
    %9 = vector.extract_strided_slice %6 {offsets = [2, 0], sizes = [1, 32], strides = [1, 1]} : vector<8x128xf32> to vector<1x32xf32>
    %10 = vector.extract_strided_slice %6 {offsets = [3, 0], sizes = [1, 32], strides = [1, 1]} : vector<8x128xf32> to vector<1x32xf32>
    %11 = vector.extract_strided_slice %6 {offsets = [4, 0], sizes = [1, 32], strides = [1, 1]} : vector<8x128xf32> to vector<1x32xf32>
    %12 = vector.extract_strided_slice %6 {offsets = [5, 0], sizes = [1, 32], strides = [1, 1]} : vector<8x128xf32> to vector<1x32xf32>
    %13 = vector.extract_strided_slice %6 {offsets = [6, 0], sizes = [1, 96], strides = [1, 1]} : vector<8x128xf32> to vector<1x96xf32>
    %14 = vector.extract_strided_slice %6 {offsets = [7, 0], sizes = [1, 128], strides = [1, 1]} : vector<8x128xf32> to vector<1x128xf32>
    %cst = arith.constant dense<0.000000e+00> : vector<16xf32>
    %15 = vector.multi_reduction <add>, %4, %cst [1] : vector<16x32xf32> to vector<16xf32>
    %16 = vector.shape_cast %15 : vector<16xf32> to vector<16x1xf32>
    %cst_6 = arith.constant 3.200000e+01 : f32
    %17 = vector.broadcast %cst_6 : f32 to vector<16x1xf32>
    %18 = arith.divf %16, %17 : vector<16x1xf32>
    %19 = vector.broadcast %18 : vector<16x1xf32> to vector<16x32xf32>
    %20 = arith.subf %4, %19 : vector<16x32xf32>
    %21 = arith.mulf %20, %20 : vector<16x32xf32>
    %cst_7 = arith.constant dense<0.000000e+00> : vector<16xf32>
    %22 = vector.multi_reduction <add>, %21, %cst_7 [1] : vector<16x32xf32> to vector<16xf32>
    %23 = vector.shape_cast %22 : vector<16xf32> to vector<16x1xf32>
    %cst_8 = arith.constant 3.200000e+01 : f32
    %24 = vector.broadcast %cst_8 : f32 to vector<16x1xf32>
    %25 = arith.divf %23, %24 : vector<16x1xf32>
    %26 = vector.broadcast %18 : vector<16x1xf32> to vector<16x32xf32>
    %27 = arith.subf %4, %26 : vector<16x32xf32>
    %cst_9 = arith.constant 9.99999974E-6 : f32
    %28 = vector.broadcast %cst_9 : f32 to vector<16x1xf32>
    %29 = arith.addf %25, %28 : vector<16x1xf32>
    %30 = math.rsqrt %29 : vector<16x1xf32>
    %31 = vector.broadcast %30 : vector<16x1xf32> to vector<16x32xf32>
    %32 = arith.mulf %27, %31 : vector<16x32xf32>
    %33 = vector.broadcast %7 : vector<1x32xf32> to vector<16x32xf32>
    %34 = arith.mulf %32, %33 : vector<16x32xf32>
    %35 = vector.broadcast %8 : vector<1x32xf32> to vector<16x32xf32>
    %36 = arith.addf %34, %35 : vector<16x32xf32>
    %37 = arith.truncf %36 : vector<16x32xf32> to vector<16x32xbf16>
    %c0_10 = arith.constant 0 : index
    %c0_11 = arith.constant 0 : index
    %c0_12 = arith.constant 0 : index
    %38 = vector.load %arg8[%c0_10, %c0_11, %c0_12] : memref<1x32x96xbf16, #tpu.memory_space<vmem>>, vector<1x32x96xbf16>
    %39 = vector.shape_cast %38 : vector<1x32x96xbf16> to vector<32x96xbf16>
    %cst_13 = arith.constant dense<0.000000e+00> : vector<16x96xf32>
    %40 = tpu.matmul %37, %39, %cst_13 {dimension_numbers = #tpu.dot_dimension_numbers<[1], [0], [0], [1], [0, 0, 1, 1], [], []>} : vector<16x32xbf16>, vector<32x96xbf16>, vector<16x96xf32> -> vector<16x96xf32>
    %41 = vector.broadcast %13 : vector<1x96xf32> to vector<16x96xf32>
    %42 = arith.addf %40, %41 : vector<16x96xf32>
    %43 = vector.shape_cast %42 : vector<16x96xf32> to vector<2x8x96xf32>
    %44 = tpu.iota {dimensions = array<i32: 2>} : vector<1x1x8xi32>
    %c5_i32 = arith.constant 5 : i32
    %45 = vector.broadcast %c5_i32 : i32 to vector<1x1x8xi32>
    %46 = arith.cmpi sge, %44, %45 : vector<1x1x8xi32>
    %cst_14 = arith.constant -1.000000e+30 : f32
    %cst_15 = arith.constant 0.000000e+00 : f32
    %47 = vector.broadcast %cst_14 : f32 to vector<1x1x8xf32>
    %48 = vector.broadcast %cst_15 : f32 to vector<1x1x8xf32>
    %49 = arith.select %46, %47, %48 : vector<1x1x8xi1>, vector<1x1x8xf32>
    %cst_16 = arith.constant 0.000000e+00 : f32
    %50 = vector.broadcast %cst_16 : f32 to vector<2x1x8xf32>
    %51 = vector.extract_strided_slice %43 {offsets = [0, 0, 0], sizes = [2, 8, 8], strides = [1, 1, 1]} : vector<2x8x96xf32> to vector<2x8x8xf32>
    %52 = vector.extract_strided_slice %43 {offsets = [0, 0, 32], sizes = [2, 8, 8], strides = [1, 1, 1]} : vector<2x8x96xf32> to vector<2x8x8xf32>
    %53 = vector.extract_strided_slice %43 {offsets = [0, 0, 64], sizes = [2, 8, 8], strides = [1, 1, 1]} : vector<2x8x96xf32> to vector<2x8x8xf32>
    %54 = arith.truncf %51 : vector<2x8x8xf32> to vector<2x8x8xbf16>
    %55 = arith.truncf %52 : vector<2x8x8xf32> to vector<2x8x8xbf16>
    "tpu.trace_start"() <{level = 10 : i32, message = "bqd,bkd->bqk"}> : () -> ()
    %cst_17 = arith.constant dense<0.000000e+00> : vector<2x8x8xf32>
    %56 = tpu.matmul %54, %55, %cst_17 {dimension_numbers = #tpu.dot_dimension_numbers<[2], [2], [1], [1], [0, 0, 0, 1, 1, 1], [0], [0]>} : vector<2x8x8xbf16>, vector<2x8x8xbf16>, vector<2x8x8xf32> -> vector<2x8x8xf32>
    "tpu.trace_stop"() : () -> ()
    %57 = vector.broadcast %49 : vector<1x1x8xf32> to vector<2x8x8xf32>
    %58 = arith.addf %56, %57 : vector<2x8x8xf32>
    %cst_18 = arith.constant dense<0xFF800000> : vector<2x8xf32>
    %59 = vector.multi_reduction <maximumf>, %58, %cst_18 [2] : vector<2x8x8xf32> to vector<2x8xf32>
    %60 = vector.shape_cast %59 : vector<2x8xf32> to vector<2x8x1xf32>
    %61 = vector.broadcast %60 : vector<2x8x1xf32> to vector<2x8x8xf32>
    %62 = arith.subf %58, %61 : vector<2x8x8xf32>
    %63 = math.exp %62 : vector<2x8x8xf32>
    %cst_19 = arith.constant dense<0.000000e+00> : vector<2x8xf32>
    %64 = vector.multi_reduction <add>, %63, %cst_19 [2] : vector<2x8x8xf32> to vector<2x8xf32>
    %65 = vector.shape_cast %64 : vector<2x8xf32> to vector<2x8x1xf32>
    %66 = vector.broadcast %65 : vector<2x8x1xf32> to vector<2x8x8xf32>
    %67 = arith.divf %63, %66 : vector<2x8x8xf32>
    %68 = arith.truncf %67 : vector<2x8x8xf32> to vector<2x8x8xbf16>
    %69 = arith.truncf %53 : vector<2x8x8xf32> to vector<2x8x8xbf16>
    "tpu.trace_start"() <{level = 10 : i32, message = "bqk,bkd->bqd"}> : () -> ()
    %cst_20 = arith.constant dense<0.000000e+00> : vector<2x8x8xf32>
    %70 = tpu.matmul %68, %69, %cst_20 {dimension_numbers = #tpu.dot_dimension_numbers<[2], [1], [1], [2], [0, 0, 0, 1, 1, 2], [0], [0]>} : vector<2x8x8xbf16>, vector<2x8x8xbf16>, vector<2x8x8xf32> -> vector<2x8x8xf32>
    "tpu.trace_stop"() : () -> ()
    %71 = vector.extract_strided_slice %67 {offsets = [0, 0, 0], sizes = [2, 1, 8], strides = [1, 1, 1]} : vector<2x8x8xf32> to vector<2x1x8xf32>
    %72 = arith.addf %50, %71 : vector<2x1x8xf32>
    %73 = vector.extract_strided_slice %43 {offsets = [0, 0, 8], sizes = [2, 8, 8], strides = [1, 1, 1]} : vector<2x8x96xf32> to vector<2x8x8xf32>
    %74 = vector.extract_strided_slice %43 {offsets = [0, 0, 40], sizes = [2, 8, 8], strides = [1, 1, 1]} : vector<2x8x96xf32> to vector<2x8x8xf32>
    %75 = vector.extract_strided_slice %43 {offsets = [0, 0, 72], sizes = [2, 8, 8], strides = [1, 1, 1]} : vector<2x8x96xf32> to vector<2x8x8xf32>
    %76 = arith.truncf %73 : vector<2x8x8xf32> to vector<2x8x8xbf16>
    %77 = arith.truncf %74 : vector<2x8x8xf32> to vector<2x8x8xbf16>
    "tpu.trace_start"() <{level = 10 : i32, message = "bqd,bkd->bqk"}> : () -> ()
    %cst_21 = arith.constant dense<0.000000e+00> : vector<2x8x8xf32>
    %78 = tpu.matmul %76, %77, %cst_21 {dimension_numbers = #tpu.dot_dimension_numbers<[2], [2], [1], [1], [0, 0, 0, 1, 1, 1], [0], [0]>} : vector<2x8x8xbf16>, vector<2x8x8xbf16>, vector<2x8x8xf32> -> vector<2x8x8xf32>
    "tpu.trace_stop"() : () -> ()
    %79 = vector.broadcast %49 : vector<1x1x8xf32> to vector<2x8x8xf32>
    %80 = arith.addf %78, %79 : vector<2x8x8xf32>
    %cst_22 = arith.constant dense<0xFF800000> : vector<2x8xf32>
    %81 = vector.multi_reduction <maximumf>, %80, %cst_22 [2] : vector<2x8x8xf32> to vector<2x8xf32>
    %82 = vector.shape_cast %81 : vector<2x8xf32> to vector<2x8x1xf32>
    %83 = vector.broadcast %82 : vector<2x8x1xf32> to vector<2x8x8xf32>
    %84 = arith.subf %80, %83 : vector<2x8x8xf32>
    %85 = math.exp %84 : vector<2x8x8xf32>
    %cst_23 = arith.constant dense<0.000000e+00> : vector<2x8xf32>
    %86 = vector.multi_reduction <add>, %85, %cst_23 [2] : vector<2x8x8xf32> to vector<2x8xf32>
    %87 = vector.shape_cast %86 : vector<2x8xf32> to vector<2x8x1xf32>
    %88 = vector.broadcast %87 : vector<2x8x1xf32> to vector<2x8x8xf32>
    %89 = arith.divf %85, %88 : vector<2x8x8xf32>
    %90 = arith.truncf %89 : vector<2x8x8xf32> to vector<2x8x8xbf16>
    %91 = arith.truncf %75 : vector<2x8x8xf32> to vector<2x8x8xbf16>
    "tpu.trace_start"() <{level = 10 : i32, message = "bqk,bkd->bqd"}> : () -> ()
    %cst_24 = arith.constant dense<0.000000e+00> : vector<2x8x8xf32>
    %92 = tpu.matmul %90, %91, %cst_24 {dimension_numbers = #tpu.dot_dimension_numbers<[2], [1], [1], [2], [0, 0, 0, 1, 1, 2], [0], [0]>} : vector<2x8x8xbf16>, vector<2x8x8xbf16>, vector<2x8x8xf32> -> vector<2x8x8xf32>
    "tpu.trace_stop"() : () -> ()
    %93 = vector.extract_strided_slice %89 {offsets = [0, 0, 0], sizes = [2, 1, 8], strides = [1, 1, 1]} : vector<2x8x8xf32> to vector<2x1x8xf32>
    %94 = arith.addf %72, %93 : vector<2x1x8xf32>
    %95 = vector.extract_strided_slice %43 {offsets = [0, 0, 16], sizes = [2, 8, 8], strides = [1, 1, 1]} : vector<2x8x96xf32> to vector<2x8x8xf32>
    %96 = vector.extract_strided_slice %43 {offsets = [0, 0, 48], sizes = [2, 8, 8], strides = [1, 1, 1]} : vector<2x8x96xf32> to vector<2x8x8xf32>
    %97 = vector.extract_strided_slice %43 {offsets = [0, 0, 80], sizes = [2, 8, 8], strides = [1, 1, 1]} : vector<2x8x96xf32> to vector<2x8x8xf32>
    %98 = arith.truncf %95 : vector<2x8x8xf32> to vector<2x8x8xbf16>
    %99 = arith.truncf %96 : vector<2x8x8xf32> to vector<2x8x8xbf16>
    "tpu.trace_start"() <{level = 10 : i32, message = "bqd,bkd->bqk"}> : () -> ()
    %cst_25 = arith.constant dense<0.000000e+00> : vector<2x8x8xf32>
    %100 = tpu.matmul %98, %99, %cst_25 {dimension_numbers = #tpu.dot_dimension_numbers<[2], [2], [1], [1], [0, 0, 0, 1, 1, 1], [0], [0]>} : vector<2x8x8xbf16>, vector<2x8x8xbf16>, vector<2x8x8xf32> -> vector<2x8x8xf32>
    "tpu.trace_stop"() : () -> ()
    %101 = vector.broadcast %49 : vector<1x1x8xf32> to vector<2x8x8xf32>
    %102 = arith.addf %100, %101 : vector<2x8x8xf32>
    %cst_26 = arith.constant dense<0xFF800000> : vector<2x8xf32>
    %103 = vector.multi_reduction <maximumf>, %102, %cst_26 [2] : vector<2x8x8xf32> to vector<2x8xf32>
    %104 = vector.shape_cast %103 : vector<2x8xf32> to vector<2x8x1xf32>
    %105 = vector.broadcast %104 : vector<2x8x1xf32> to vector<2x8x8xf32>
    %106 = arith.subf %102, %105 : vector<2x8x8xf32>
    %107 = math.exp %106 : vector<2x8x8xf32>
    %cst_27 = arith.constant dense<0.000000e+00> : vector<2x8xf32>
    %108 = vector.multi_reduction <add>, %107, %cst_27 [2] : vector<2x8x8xf32> to vector<2x8xf32>
    %109 = vector.shape_cast %108 : vector<2x8xf32> to vector<2x8x1xf32>
    %110 = vector.broadcast %109 : vector<2x8x1xf32> to vector<2x8x8xf32>
    %111 = arith.divf %107, %110 : vector<2x8x8xf32>
    %112 = arith.truncf %111 : vector<2x8x8xf32> to vector<2x8x8xbf16>
    %113 = arith.truncf %97 : vector<2x8x8xf32> to vector<2x8x8xbf16>
    "tpu.trace_start"() <{level = 10 : i32, message = "bqk,bkd->bqd"}> : () -> ()
    %cst_28 = arith.constant dense<0.000000e+00> : vector<2x8x8xf32>
    %114 = tpu.matmul %112, %113, %cst_28 {dimension_numbers = #tpu.dot_dimension_numbers<[2], [1], [1], [2], [0, 0, 0, 1, 1, 2], [0], [0]>} : vector<2x8x8xbf16>, vector<2x8x8xbf16>, vector<2x8x8xf32> -> vector<2x8x8xf32>
    "tpu.trace_stop"() : () -> ()
    %115 = vector.extract_strided_slice %111 {offsets = [0, 0, 0], sizes = [2, 1, 8], strides = [1, 1, 1]} : vector<2x8x8xf32> to vector<2x1x8xf32>
    %116 = arith.addf %94, %115 : vector<2x1x8xf32>
    %117 = vector.extract_strided_slice %43 {offsets = [0, 0, 24], sizes = [2, 8, 8], strides = [1, 1, 1]} : vector<2x8x96xf32> to vector<2x8x8xf32>
    %118 = vector.extract_strided_slice %43 {offsets = [0, 0, 56], sizes = [2, 8, 8], strides = [1, 1, 1]} : vector<2x8x96xf32> to vector<2x8x8xf32>
    %119 = vector.extract_strided_slice %43 {offsets = [0, 0, 88], sizes = [2, 8, 8], strides = [1, 1, 1]} : vector<2x8x96xf32> to vector<2x8x8xf32>
    %120 = arith.truncf %117 : vector<2x8x8xf32> to vector<2x8x8xbf16>
    %121 = arith.truncf %118 : vector<2x8x8xf32> to vector<2x8x8xbf16>
    "tpu.trace_start"() <{level = 10 : i32, message = "bqd,bkd->bqk"}> : () -> ()
    %cst_29 = arith.constant dense<0.000000e+00> : vector<2x8x8xf32>
    %122 = tpu.matmul %120, %121, %cst_29 {dimension_numbers = #tpu.dot_dimension_numbers<[2], [2], [1], [1], [0, 0, 0, 1, 1, 1], [0], [0]>} : vector<2x8x8xbf16>, vector<2x8x8xbf16>, vector<2x8x8xf32> -> vector<2x8x8xf32>
    "tpu.trace_stop"() : () -> ()
    %123 = vector.broadcast %49 : vector<1x1x8xf32> to vector<2x8x8xf32>
    %124 = arith.addf %122, %123 : vector<2x8x8xf32>
    %cst_30 = arith.constant dense<0xFF800000> : vector<2x8xf32>
    %125 = vector.multi_reduction <maximumf>, %124, %cst_30 [2] : vector<2x8x8xf32> to vector<2x8xf32>
    %126 = vector.shape_cast %125 : vector<2x8xf32> to vector<2x8x1xf32>
    %127 = vector.broadcast %126 : vector<2x8x1xf32> to vector<2x8x8xf32>
    %128 = arith.subf %124, %127 : vector<2x8x8xf32>
    %129 = math.exp %128 : vector<2x8x8xf32>
    %cst_31 = arith.constant dense<0.000000e+00> : vector<2x8xf32>
    %130 = vector.multi_reduction <add>, %129, %cst_31 [2] : vector<2x8x8xf32> to vector<2x8xf32>
    %131 = vector.shape_cast %130 : vector<2x8xf32> to vector<2x8x1xf32>
    %132 = vector.broadcast %131 : vector<2x8x1xf32> to vector<2x8x8xf32>
    %133 = arith.divf %129, %132 : vector<2x8x8xf32>
    %134 = arith.truncf %133 : vector<2x8x8xf32> to vector<2x8x8xbf16>
    %135 = arith.truncf %119 : vector<2x8x8xf32> to vector<2x8x8xbf16>
    "tpu.trace_start"() <{level = 10 : i32, message = "bqk,bkd->bqd"}> : () -> ()
    %cst_32 = arith.constant dense<0.000000e+00> : vector<2x8x8xf32>
    %136 = tpu.matmul %134, %135, %cst_32 {dimension_numbers = #tpu.dot_dimension_numbers<[2], [1], [1], [2], [0, 0, 0, 1, 1, 2], [0], [0]>} : vector<2x8x8xbf16>, vector<2x8x8xbf16>, vector<2x8x8xf32> -> vector<2x8x8xf32>
    "tpu.trace_stop"() : () -> ()
    %137 = vector.extract_strided_slice %133 {offsets = [0, 0, 0], sizes = [2, 1, 8], strides = [1, 1, 1]} : vector<2x8x8xf32> to vector<2x1x8xf32>
    %138 = arith.addf %116, %137 : vector<2x1x8xf32>
    %139 = tpu.concatenate %70, %92, %114, %136 in 2 : vector<2x8x8xf32>, vector<2x8x8xf32>, vector<2x8x8xf32>, vector<2x8x8xf32> -> vector<2x8x32xf32>
    %140 = vector.shape_cast %139 : vector<2x8x32xf32> to vector<16x32xf32>
    %141 = arith.truncf %140 : vector<16x32xf32> to vector<16x32xbf16>
    %c0_33 = arith.constant 0 : index
    %c0_34 = arith.constant 0 : index
    %c0_35 = arith.constant 0 : index
    %142 = vector.load %arg9[%c0_33, %c0_34, %c0_35] : memref<1x32x32xbf16, #tpu.memory_space<vmem>>, vector<1x32x32xbf16>
    %143 = vector.shape_cast %142 : vector<1x32x32xbf16> to vector<32x32xbf16>
    %cst_36 = arith.constant dense<0.000000e+00> : vector<16x32xf32>
    %144 = tpu.matmul %141, %143, %cst_36 {dimension_numbers = #tpu.dot_dimension_numbers<[1], [0], [0], [1], [0, 0, 1, 1], [], []>} : vector<16x32xbf16>, vector<32x32xbf16>, vector<16x32xf32> -> vector<16x32xf32>
    %145 = vector.broadcast %11 : vector<1x32xf32> to vector<16x32xf32>
    %146 = arith.addf %144, %145 : vector<16x32xf32>
    %147 = arith.addf %4, %146 : vector<16x32xf32>
    %cst_37 = arith.constant dense<0.000000e+00> : vector<16xf32>
    %148 = vector.multi_reduction <add>, %147, %cst_37 [1] : vector<16x32xf32> to vector<16xf32>
    %149 = vector.shape_cast %148 : vector<16xf32> to vector<16x1xf32>
    %cst_38 = arith.constant 3.200000e+01 : f32
    %150 = vector.broadcast %cst_38 : f32 to vector<16x1xf32>
    %151 = arith.divf %149, %150 : vector<16x1xf32>
    %152 = vector.broadcast %151 : vector<16x1xf32> to vector<16x32xf32>
    %153 = arith.subf %147, %152 : vector<16x32xf32>
    %154 = arith.mulf %153, %153 : vector<16x32xf32>
    %cst_39 = arith.constant dense<0.000000e+00> : vector<16xf32>
    %155 = vector.multi_reduction <add>, %154, %cst_39 [1] : vector<16x32xf32> to vector<16xf32>
    %156 = vector.shape_cast %155 : vector<16xf32> to vector<16x1xf32>
    %cst_40 = arith.constant 3.200000e+01 : f32
    %157 = vector.broadcast %cst_40 : f32 to vector<16x1xf32>
    %158 = arith.divf %156, %157 : vector<16x1xf32>
    %159 = vector.broadcast %151 : vector<16x1xf32> to vector<16x32xf32>
    %160 = arith.subf %147, %159 : vector<16x32xf32>
    %cst_41 = arith.constant 9.99999974E-6 : f32
    %161 = vector.broadcast %cst_41 : f32 to vector<16x1xf32>
    %162 = arith.addf %158, %161 : vector<16x1xf32>
    %163 = math.rsqrt %162 : vector<16x1xf32>
    %164 = vector.broadcast %163 : vector<16x1xf32> to vector<16x32xf32>
    %165 = arith.mulf %160, %164 : vector<16x32xf32>
    %166 = vector.broadcast %9 : vector<1x32xf32> to vector<16x32xf32>
    %167 = arith.mulf %165, %166 : vector<16x32xf32>
    %168 = vector.broadcast %10 : vector<1x32xf32> to vector<16x32xf32>
    %169 = arith.addf %167, %168 : vector<16x32xf32>
    %170 = arith.truncf %169 : vector<16x32xf32> to vector<16x32xbf16>
    %c0_42 = arith.constant 0 : index
    %c0_43 = arith.constant 0 : index
    %c0_44 = arith.constant 0 : index
    %171 = vector.load %arg10[%c0_42, %c0_43, %c0_44] : memref<1x32x128xbf16, #tpu.memory_space<vmem>>, vector<1x32x128xbf16>
    %172 = vector.shape_cast %171 : vector<1x32x128xbf16> to vector<32x128xbf16>
    %cst_45 = arith.constant dense<0.000000e+00> : vector<16x128xf32>
    %173 = tpu.matmul %170, %172, %cst_45 {dimension_numbers = #tpu.dot_dimension_numbers<[1], [0], [0], [1], [0, 0, 1, 1], [], []>} : vector<16x32xbf16>, vector<32x128xbf16>, vector<16x128xf32> -> vector<16x128xf32>
    %174 = vector.broadcast %14 : vector<1x128xf32> to vector<16x128xf32>
    %175 = arith.addf %173, %174 : vector<16x128xf32>
    %cst_46 = arith.constant 1.702000e+00 : f32
    %176 = vector.broadcast %cst_46 : f32 to vector<16x128xf32>
    %177 = arith.mulf %176, %175 : vector<16x128xf32>
    %178 = arith.negf %177 : vector<16x128xf32>
    %179 = math.exp %178 : vector<16x128xf32>
    %cst_47 = arith.constant 1.000000e+00 : f32
    %180 = vector.broadcast %cst_47 : f32 to vector<16x128xf32>
    %181 = arith.addf %180, %179 : vector<16x128xf32>
    %182 = arith.divf %180, %181 : vector<16x128xf32>
    %183 = arith.mulf %175, %182 : vector<16x128xf32>
    %184 = arith.truncf %183 : vector<16x128xf32> to vector<16x128xbf16>
    %c0_48 = arith.constant 0 : index
    %c0_49 = arith.constant 0 : index
    %c0_50 = arith.constant 0 : index
    %185 = vector.load %arg11[%c0_48, %c0_49, %c0_50] : memref<1x128x32xbf16, #tpu.memory_space<vmem>>, vector<1x128x32xbf16>
    %186 = vector.shape_cast %185 : vector<1x128x32xbf16> to vector<128x32xbf16>
    %cst_51 = arith.constant dense<0.000000e+00> : vector<16x32xf32>
    %187 = tpu.matmul %184, %186, %cst_51 {dimension_numbers = #tpu.dot_dimension_numbers<[1], [0], [0], [1], [0, 0, 1, 1], [], []>} : vector<16x128xbf16>, vector<128x32xbf16>, vector<16x32xf32> -> vector<16x32xf32>
    %188 = vector.broadcast %12 : vector<1x32xf32> to vector<16x32xf32>
    %189 = arith.addf %187, %188 : vector<16x32xf32>
    %190 = arith.addf %147, %189 : vector<16x32xf32>
    %191 = vector.shape_cast %190 : vector<16x32xf32> to vector<2x8x32xf32>
    %c0_52 = arith.constant 0 : index
    %c0_53 = arith.constant 0 : index
    %c0_54 = arith.constant 0 : index
    %192 = vector.load %arg16[%c0_52, %c0_53, %c0_54] : memref<2x8x32xf32, #tpu.memory_space<vmem>>, vector<2x8x32xf32>
    tpu.vector_store %arg16[%c0_52, %c0_53, %c0_54], %191 {strides = array<i32>} : memref<2x8x32xf32, #tpu.memory_space<vmem>>, vector<2x8x32xf32>,
    %c1_i32 = arith.constant 1 : i32
    %193 = arith.cmpi eq, %arg1, %c1_i32 : i32
    %194 = arith.extui %193 : i1 to i32
    %c0_i32_55 = arith.constant 0 : i32
    %195 = arith.cmpi ne, %194, %c0_i32_55 : i32
    scf.if %195 {
      %c0_56 = arith.constant 0 : index
      %c0_57 = arith.constant 0 : index
      %196 = vector.load %arg12[%c0_56, %c0_57] : memref<2x32xf32, #tpu.memory_space<vmem>>, vector<1x32xf32>
      %c1 = arith.constant 1 : index
      %c0_58 = arith.constant 0 : index
      %197 = vector.load %arg12[%c1, %c0_58] : memref<2x32xf32, #tpu.memory_space<vmem>>, vector<1x32xf32>
      %cst_59 = arith.constant dense<0.000000e+00> : vector<16xf32>
      %198 = vector.multi_reduction <add>, %190, %cst_59 [1] : vector<16x32xf32> to vector<16xf32>
      %199 = vector.shape_cast %198 : vector<16xf32> to vector<16x1xf32>
      %cst_60 = arith.constant 3.200000e+01 : f32
      %200 = vector.broadcast %cst_60 : f32 to vector<16x1xf32>
      %201 = arith.divf %199, %200 : vector<16x1xf32>
      %202 = vector.broadcast %201 : vector<16x1xf32> to vector<16x32xf32>
      %203 = arith.subf %190, %202 : vector<16x32xf32>
      %204 = arith.mulf %203, %203 : vector<16x32xf32>
      %cst_61 = arith.constant dense<0.000000e+00> : vector<16xf32>
      %205 = vector.multi_reduction <add>, %204, %cst_61 [1] : vector<16x32xf32> to vector<16xf32>
      %206 = vector.shape_cast %205 : vector<16xf32> to vector<16x1xf32>
      %cst_62 = arith.constant 3.200000e+01 : f32
      %207 = vector.broadcast %cst_62 : f32 to vector<16x1xf32>
      %208 = arith.divf %206, %207 : vector<16x1xf32>
      %209 = vector.broadcast %201 : vector<16x1xf32> to vector<16x32xf32>
      %210 = arith.subf %190, %209 : vector<16x32xf32>
      %cst_63 = arith.constant 9.99999974E-6 : f32
      %211 = vector.broadcast %cst_63 : f32 to vector<16x1xf32>
      %212 = arith.addf %208, %211 : vector<16x1xf32>
      %213 = math.rsqrt %212 : vector<16x1xf32>
      %214 = vector.broadcast %213 : vector<16x1xf32> to vector<16x32xf32>
      %215 = arith.mulf %210, %214 : vector<16x32xf32>
      %216 = vector.broadcast %196 : vector<1x32xf32> to vector<16x32xf32>
      %217 = arith.mulf %215, %216 : vector<16x32xf32>
      %218 = vector.broadcast %197 : vector<1x32xf32> to vector<16x32xf32>
      %219 = arith.addf %217, %218 : vector<16x32xf32>
      %220 = arith.truncf %219 : vector<16x32xf32> to vector<16x32xbf16>
      %c0_64 = arith.constant 0 : index
      %c0_65 = arith.constant 0 : index
      %221 = vector.load %arg13[%c0_64, %c0_65] : memref<32x16xbf16, #tpu.memory_space<vmem>>, vector<32x16xbf16>
      %cst_66 = arith.constant dense<0.000000e+00> : vector<16x16xf32>
      %222 = tpu.matmul %220, %221, %cst_66 {dimension_numbers = #tpu.dot_dimension_numbers<[1], [0], [0], [1], [0, 0, 1, 1], [], []>} : vector<16x32xbf16>, vector<32x16xbf16>, vector<16x16xf32> -> vector<16x16xf32>
      %223 = vector.shape_cast %222 : vector<16x16xf32> to vector<2x8x16xf32>
      %c0_67 = arith.constant 0 : index
      %c0_68 = arith.constant 0 : index
      %c0_69 = arith.constant 0 : index
      %224 = vector.load %arg14[%c0_67, %c0_68, %c0_69] : memref<2x8x16xf32, #tpu.memory_space<vmem>>, vector<2x8x16xf32>
      tpu.vector_store %arg14[%c0_67, %c0_68, %c0_69], %223 {strides = array<i32>} : memref<2x8x16xf32, #tpu.memory_space<vmem>>, vector<2x8x16xf32>,
      %cst_70 = arith.constant 2.500000e-01 : f32
      %225 = vector.broadcast %cst_70 : f32 to vector<2x1x8xf32>
      %226 = arith.mulf %138, %225 : vector<2x1x8xf32>
      %c0_71 = arith.constant 0 : index
      %c0_72 = arith.constant 0 : index
      %c0_73 = arith.constant 0 : index
      %227 = vector.load %arg15[%c0_71, %c0_72, %c0_73] : memref<2x1x8xf32, #tpu.memory_space<vmem>>, vector<2x1x8xf32>
      tpu.vector_store %arg15[%c0_71, %c0_72, %c0_73], %226 {strides = array<i32>} : memref<2x1x8xf32, #tpu.memory_space<vmem>>, vector<2x1x8xf32>,
    } else {
    }
    return
  }
  func.func @transform_0(%arg0: i32, %arg1: i32) -> (i32, i32, i32) {
    %c0_i32 = arith.constant 0 : i32
    %c0_i32_0 = arith.constant 0 : i32
    %c0_i32_1 = arith.constant 0 : i32
    return %arg0, %c0_i32, %c0_i32_0 : i32, i32, i32
  }
  func.func @transform_1(%arg0: i32, %arg1: i32) -> (i32, i32) {
    %c0_i32 = arith.constant 0 : i32
    %c0_i32_0 = arith.constant 0 : i32
    %c0_i32_1 = arith.constant 0 : i32
    return %c0_i32, %c0_i32_0 : i32, i32
  }
  func.func @transform_2(%arg0: i32, %arg1: i32) -> (i32, i32) {
    %c0_i32 = arith.constant 0 : i32
    %c0_i32_0 = arith.constant 0 : i32
    %c0_i32_1 = arith.constant 0 : i32
    return %c0_i32, %c0_i32_0 : i32, i32
  }
  func.func @transform_3(%arg0: i32, %arg1: i32) -> (i32, i32) {
    %c0_i32 = arith.constant 0 : i32
    %c0_i32_0 = arith.constant 0 : i32
    %c0_i32_1 = arith.constant 0 : i32
    return %c0_i32, %c0_i32_0 : i32, i32
  }
  func.func @transform_4(%arg0: i32, %arg1: i32) -> (i32, i32) {
    %c0_i32 = arith.constant 0 : i32
    %c0_i32_0 = arith.constant 0 : i32
    %c0_i32_1 = arith.constant 0 : i32
    return %c0_i32, %c0_i32_0 : i32, i32
  }
  func.func @transform_5(%arg0: i32, %arg1: i32) -> (i32, i32, i32) {
    %c0_i32 = arith.constant 0 : i32
    %c0_i32_0 = arith.constant 0 : i32
    %c0_i32_1 = arith.constant 0 : i32
    return %arg1, %c0_i32, %c0_i32_0 : i32, i32, i32
  }
  func.func @transform_6(%arg0: i32, %arg1: i32) -> (i32, i32, i32) {
    %c0_i32 = arith.constant 0 : i32
    %c0_i32_0 = arith.constant 0 : i32
    %c0_i32_1 = arith.constant 0 : i32
    return %arg1, %c0_i32, %c0_i32_0 : i32, i32, i32
  }
  func.func @transform_7(%arg0: i32, %arg1: i32) -> (i32, i32, i32) {
    %c0_i32 = arith.constant 0 : i32
    %c0_i32_0 = arith.constant 0 : i32
    %c0_i32_1 = arith.constant 0 : i32
    return %arg1, %c0_i32, %c0_i32_0 : i32, i32, i32
  }
  func.func @transform_8(%arg0: i32, %arg1: i32) -> (i32, i32, i32) {
    %c0_i32 = arith.constant 0 : i32
    %c0_i32_0 = arith.constant 0 : i32
    %c0_i32_1 = arith.constant 0 : i32
    return %arg1, %c0_i32, %c0_i32_0 : i32, i32, i32
  }
  func.func @transform_9(%arg0: i32, %arg1: i32) -> (i32, i32, i32) {
    %c0_i32 = arith.constant 0 : i32
    %c0_i32_0 = arith.constant 0 : i32
    %c0_i32_1 = arith.constant 0 : i32
    return %arg1, %c0_i32, %c0_i32_0 : i32, i32, i32
  }
  func.func @transform_10(%arg0: i32, %arg1: i32) -> (i32, i32) {
    %c0_i32 = arith.constant 0 : i32
    %c0_i32_0 = arith.constant 0 : i32
    %c0_i32_1 = arith.constant 0 : i32
    return %c0_i32, %c0_i32_0 : i32, i32
  }
  func.func @transform_11(%arg0: i32, %arg1: i32) -> (i32, i32) {
    %c0_i32 = arith.constant 0 : i32
    %c0_i32_0 = arith.constant 0 : i32
    %c0_i32_1 = arith.constant 0 : i32
    return %c0_i32, %c0_i32_0 : i32, i32
  }
  func.func @transform_12(%arg0: i32, %arg1: i32) -> (i32, i32, i32) {
    %c0_i32 = arith.constant 0 : i32
    %c0_i32_0 = arith.constant 0 : i32
    %c0_i32_1 = arith.constant 0 : i32
    return %arg0, %c0_i32, %c0_i32_0 : i32, i32, i32
  }
  func.func @transform_13(%arg0: i32, %arg1: i32) -> (i32, i32, i32) {
    %c0_i32 = arith.constant 0 : i32
    %c0_i32_0 = arith.constant 0 : i32
    %c0_i32_1 = arith.constant 0 : i32
    return %arg0, %c0_i32, %c0_i32_0 : i32, i32, i32
  }
}

</mosaic_0001>

<bundles_post_ra>
// kernel: tpu_custom_call.1
= control target key start
LH: loop header
LB: loop body
LE: loop exit
PB: predicated region body
PF: predicated region fallthrough
CT: control target
= control target key end

     0   :  { %s3690_s0 = inlined_call_operand.vmem [shape: f32[2,4,192], index: 0, kind: input, shape index: {}]   ;;  %s3691_s1 = inlined_call_operand.vmem [shape: bf16[192,32], index: 1, kind: input, shape index: {}]   ;;  %s3692_s2 = inlined_call_operand.vmem [shape: f32[1,32], index: 2, kind: input, shape index: {}]   ;;  %s3693_s3 = inlined_call_operand.vmem [shape: f32[8,32], index: 3, kind: input, shape index: {}]   ;;  %s3694_s4 = inlined_call_operand.vmem [shape: f32[2,32], index: 4, kind: input, shape index: {}]   ;;  %s3695_s5 = inlined_call_operand.vmem [shape: f32[2,8,128], index: 5, kind: input, shape index: {}]   ;;  %s3696_s6 = inlined_call_operand.vmem [shape: bf16[2,32,96], index: 6, kind: input, shape index: {}]   ;;  %s3697_s7 = inlined_call_operand.vmem [shape: bf16[2,32,32], index: 7, kind: input, shape index: {}]   ;;  %s3698_s8 = inlined_call_operand.vmem [shape: bf16[2,32,128], index: 8, kind: input, shape index: {}]   ;;  %s3699_s9 = inlined_call_operand.vmem [shape: bf16[2,128,32], index: 9, kind: input, shape index: {}]   ;;  %s3700_s10 = inlined_call_operand.vmem [shape: f32[2,32], index: 10, kind: input, shape index: {}]   ;;  %s3701_s11 = inlined_call_operand.vmem [shape: bf16[32,16], index: 11, kind: input, shape index: {}]   ;;  %s3702_s12 = inlined_call_operand.hbm [shape: f32[2,8,16], index: 12, kind: output, shape index: {0}]   ;;  %s3703_s13 = inlined_call_operand.hbm [shape: f32[2,1,8], index: 13, kind: output, shape index: {1}]  }
   0x1   :  { %3707 = sst [smem:[#allocation11_spill]] %s3702_s12 }
   0x2   :  { %3708 = sst [smem:[#allocation12_spill]] %s3703_s13 }
   0x3   :  { %19 = vsyncpa [#allocation4], 0 }
   0x4   :  { %20 = vsyncpa [#allocation6], 0  ;;  %s3156_s25 = smov 0   ;;  %s3158_s26 = smov 0  }
   0x5   :  { %s3160_s27 = smov 0  }
   0x6 LB: > { %3709 = sst [smem:[#allocation9_spill]] %s3057_s26  ;;  %s35_s29 = sadd.s32 1, %s3057_s26  ;;  %s3061_s27 = sphi %s3160_s27, %s26_s27   ;;  %s3057_s26 = sphi %s3158_s26, %s3718_s26   ;;  %s3053_s25 = sphi %s3156_s25, %s3717_s25  }
   0x7   : > { %p36_p0 = scmp.ge.s32.totalorder %s35_s29, 2  ;;  %p2515_p1 = scmp.ge.s32.totalorder %s3061_s27, 1 }
   0x8   : > { %p455_p2 = scmp.lt.s32.totalorder %s3061_s27, 3 }
   0x9   : > { %s3720_s29 = smov (%p36_p0, %s35_s29), 0 }
   0xa   : > { %3710 = sst [smem:[#allocation10_spill]] %s3720_s29  ;;  %p456_p3 = pnand %p2515_p1, %p455_p2 }
   0xb   : > { %p526_p4 = scmp.lt.s32.totalorder (!%p456_p3), %s3053_s25, 1  ;;  %p2525_p5 = scmp.ne.s32.totalorder (!%p456_p3), %s3053_s25, 0 }
   0xc   : > { %459 = sbr.rel (%p456_p3) target bundleno = 5350 (0x14e6), region = 68 }
  0x13   : > { %s527_s30 = scalar_select %p526_p4, %s3053_s25, 1 }
  0x14   : > { %556 = sbr.rel (%p2525_p5) target bundleno = 605 (0x25d), region = 72  ;;  %v2866_v0 = vld [vmem:[%s3691_s1] sm:$0xff] (!%p2525_p5)   ;;  %v3063_v1 = vmov (!%p2525_p5), 0   ;;  %v2868_v3 = vld [vmem:[%s3691_s1 + $0x8] sm:$0xff] (!%p2525_p5)   ;;  %v2870_v5 = vld [vmem:[%s3691_s1 + $0x10] sm:$0xff] (!%p2525_p5)   ;;  %vm662_vm0 = vcmask (!%p2525_p5), 523264  }
  0x15   : > { %s2516_s14 = sshll.u32 %s527_s30, 3  ;;  %s2602_s15 = sshll.u32 %s527_s30, 4  ;;  %666 = vmatprep.subr.bf16.mxu0 (!%p2525_p5), %v3063_v1  ;;  %847 = vmatprep.subr.bf16.mxu1 (!%p2525_p5), %v3063_v1  ;;  %v2867_v2 = vld [vmem:[%s3691_s1] sm:$0xff] (!%p2525_p5)   ;;  %v2869_v4 = vld [vmem:[%s3691_s1 + $0x8] sm:$0xff] (!%p2525_p5)   ;;  %v2871_v6 = vld [vmem:[%s3691_s1 + $0x10] sm:$0xff] (!%p2525_p5)   ;;  %vm710_vm1 = vcmask (!%p2525_p5), 1040384  }
  0x16   : > { %s3182_s18 = scalar_lea.vmem %s3695_s5, %s2516_s14  ;;  %s3187_s21 = scalar_lea.vmem %s3696_s6, %s2602_s15  ;;  %667 = vmatpush1.bf16.msra.mxu0 (!%p2525_p5), %v2866_v0  ;;  %848 = vmatpush1.bf16.msra.mxu1 (!%p2525_p5), %v2867_v2  ;;  %v2872_v7 = vld [vmem:[%s3691_s1 + $0x18] sm:$0xff] (!%p2525_p5)   ;;  %v2874_v9 = vld [vmem:[%s3691_s1 + $0x20] sm:$0xff] (!%p2525_p5)   ;;  %v2876_v11 = vld [vmem:[%s3691_s1 + $0x28] sm:$0xff] (!%p2525_p5)   ;;  %vm712_vm2 = vcmask (!%p2525_p5), 1044480   ;;  %vm715_vm3 = vcmask (!%p2525_p5), 261120  }
  0x17   : > { %s3192_s24 = scalar_lea.vmem %s3697_s7, %s2602_s15  ;;  %s3197_s26 = scalar_lea.vmem %s3698_s8, %s2602_s15  ;;  %668 = vmatprep.subr.bf16.mxu0 (!%p2525_p5), %v3063_v1  ;;  %849 = vmatprep.subr.bf16.mxu1 (!%p2525_p5), %v3063_v1  ;;  %v2873_v8 = vld [vmem:[%s3691_s1 + $0x18] sm:$0xff] (!%p2525_p5)   ;;  %v2875_v10 = vld [vmem:[%s3691_s1 + $0x20] sm:$0xff] (!%p2525_p5)   ;;  %v2877_v12 = vld [vmem:[%s3691_s1 + $0x28] sm:$0xff] (!%p2525_p5)  }
  0x18   : > { %s2605_s13 = sshll.u32 %s527_s30, 6  ;;  %v2878_v13 = vld [vmem:[%s3691_s1 + $0x30] sm:$0xff] (!%p2525_p5)   ;;  %v560_v15 = vld [vmem:[%s3690_s0] sm:$0xff] (!%p2525_p5)  ;;  %v2541_v16 = vld [vmem:[%s3690_s0 + $0x8] sm:$0xff] (!%p2525_p5) }
  0x19   : > { %s3202_s14 = scalar_lea.vmem %s3699_s9, %s2605_s13  ;;  %v2879_v14 = vld [vmem:[%s3691_s1 + $0x30] sm:$0xff] (!%p2525_p5)   ;;  %v562_v17 = vcombine.high (!%p2525_p5), %v560_v15, %v560_v15  ;;  %v744_v18 = vcombine.high (!%p2525_p5), %v2541_v16, %v2541_v16  ;;  %v2880_v19 = vld [vmem:[%s3691_s1 + $0x38] sm:$0xff] (!%p2525_p5)   ;;  %v2882_v23 = vld [vmem:[%s3691_s1 + $0x40] sm:$0xff] (!%p2525_p5)   ;;  %v564_v31 = vpack.c.bf16 (!%p2525_p5), %v560_v15, %v560_v15  ;;  %v746_v32 = vpack.c.bf16 (!%p2525_p5), %v2541_v16, %v2541_v16 }
  0x1a   : > { %669 = vmatpush1.bf16.msra.mxu0 (!%p2525_p5), %v2868_v3  ;;  %850 = vmatpush1.bf16.msra.mxu1 (!%p2525_p5), %v2869_v4  ;;  %v2881_v20 = vld [vmem:[%s3691_s1 + $0x38] sm:$0xff] (!%p2525_p5)   ;;  %v2883_v24 = vld [vmem:[%s3691_s1 + $0x40] sm:$0xff] (!%p2525_p5)   ;;  %v2884_v25 = vld [vmem:[%s3691_s1 + $0x48] sm:$0xff] (!%p2525_p5)  }
  0x1b   : > { %670 = vmatprep.subr.bf16.mxu0 %v3063_v1  ;;  %851 = vmatprep.subr.bf16.mxu1 %v3063_v1  ;;  %v565_v21 = vpack.c.bf16 %v562_v17, %v562_v17  ;;  %v747_v22 = vpack.c.bf16 %v744_v18, %v744_v18  ;;  %v2885_v26 = vld [vmem:[%s3691_s1 + $0x48] sm:$0xff]   ;;  %v2886_v27 = vld [vmem:[%s3691_s1 + $0x50] sm:$0xff]   ;;  %v2888_v29 = vld [vmem:[%s3691_s1 + $0x58] sm:$0xff]  }
  0x1c   : > { %v2887_v28 = vld [vmem:[%s3691_s1 + $0x50] sm:$0xff]   ;;  %v2889_v30 = vld [vmem:[%s3691_s1 + $0x58] sm:$0xff]   ;;  %v706_v34 = vld [vmem:[%s3692_s2] sm:$0x1] }
  0x1d   : > { %2538 = vmatprep.mubr.msk.bf16.mxu0 %vm662_vm0, %v565_v21  ;;  %2554 = vmatprep.mubr.msk.bf16.mxu1 %vm662_vm0, %v747_v22  ;;  %v887_v38 = vld [vmem:[%s3692_s2] sm:$0x1] }
  0x1e   : > { %671 = vmatpush1.bf16.msra.mxu0 %v2870_v5  ;;  %852 = vmatpush1.bf16.msra.mxu1 %v2871_v6  ;;  %v559_v42 = vld [vmem:[%s3693_s3] sm:$0xff] }
  0x1f   : > { %672 = vmatprep.subr.bf16.mxu0 %v3063_v1  ;;  %853 = vmatprep.subr.bf16.mxu1 %v3063_v1 }
  0x22   : > { %673 = vmatpush1.bf16.msra.mxu0 %v2872_v7  ;;  %854 = vmatpush1.bf16.msra.mxu1 %v2873_v8  ;;  %v2539_v7 = vld [vmem:[%s3694_s4] ss:$0 sm:$0xff] }
  0x23   : > { %674 = vmatprep.subr.bf16.mxu0 %v3063_v1  ;;  %855 = vmatprep.subr.bf16.mxu1 %v3063_v1 }
  0x26   : > { %675 = vmatpush1.bf16.msra.mxu0 %v2874_v9  ;;  %856 = vmatpush1.bf16.msra.mxu1 %v2875_v10  ;;  %v2540_v9 = vld [vmem:[%s3694_s4 + $0x1] ss:$0 sm:$0xff] }
  0x27   : > { %676 = vmatprep.subr.bf16.mxu0 %v3063_v1  ;;  %857 = vmatprep.subr.bf16.mxu1 %v3063_v1 }
  0x2a   : > { %677 = vmatpush1.bf16.msra.mxu0 %v2876_v11  ;;  %858 = vmatpush1.bf16.msra.mxu1 %v2877_v12 }
  0x2b   : > { %678 = vmatprep.subr.bf16.mxu0 %v3063_v1  ;;  %859 = vmatprep.subr.bf16.mxu1 %v3063_v1 }
  0x2e   : > { %679 = vmatpush1.bf16.msra.mxu0 %v2878_v13  ;;  %860 = vmatpush1.bf16.msra.mxu1 %v2879_v14 }
  0x2f   : > { %680 = vmatprep.subr.bf16.mxu0 %v3063_v1  ;;  %861 = vmatprep.subr.bf16.mxu1 %v3063_v1 }
  0x32   : > { %681 = vmatpush1.bf16.msra.mxu0 %v2880_v19  ;;  %862 = vmatpush1.bf16.msra.mxu1 %v2881_v20 }
  0x33   : > { %682 = vmatprep.subr.bf16.mxu0 %v3063_v1  ;;  %863 = vmatprep.subr.bf16.mxu1 %v3063_v1 }
  0x36   : > { %683 = vmatpush1.bf16.msra.mxu0 %v2882_v23  ;;  %864 = vmatpush1.bf16.msra.mxu1 %v2883_v24 }
  0x37   : > { %684 = vmatprep.subr.bf16.mxu0 %v3063_v1  ;;  %865 = vmatprep.subr.bf16.mxu1 %v3063_v1 }
  0x3a   : > { %685 = vmatpush1.bf16.msra.mxu0 %v2884_v25  ;;  %866 = vmatpush1.bf16.msra.mxu1 %v2885_v26 }
  0x3b   : > { %686 = vmatprep.subr.bf16.mxu0 %v3063_v1  ;;  %867 = vmatprep.subr.bf16.mxu1 %v3063_v1 }
  0x3e   : > { %687 = vmatpush1.bf16.msra.mxu0 %v2886_v27  ;;  %868 = vmatpush1.bf16.msra.mxu1 %v2887_v28 }
  0x3f   : > { %688 = vmatprep.subr.bf16.mxu0 %v3063_v1  ;;  %869 = vmatprep.subr.bf16.mxu1 %v3063_v1 }
  0x42   : > { %689 = vmatpush1.bf16.msra.mxu0 %v2888_v29  ;;  %870 = vmatpush1.bf16.msra.mxu1 %v2889_v30 }
  0x45   : > { %699 = vmatmul.mubr.bf16.vlgmr.msra.gmra.mrb[0].mxu0 %v564_v31  ;;  %880 = vmatmul.mubr.bf16.vlgmr.msra.gmra.mrb[0].mxu1 %v746_v32 }
 0x118   : > { %v700_v33 = vpop.f32.mrb[0].mxu0  ;;  %v881_v37 = vpop.f32.mrb[0].mxu1 }
 0x119   : > { %v708_v35 = vrot.slane %v700_v33, 7  ;;  %v702_v36 = vpop.f32.mrb[1].mxu0  ;;  %v889_v39 = vrot.slane %v881_v37, 7  ;;  %v883_v41 = vpop.f32.mrb[1].mxu1 }
 0x11a   : > { %v703_v40 = vpop.f32.mrb[2].mxu0  ;;  %v884_v44 = vpop.f32.mrb[2].mxu1 }
 0x11b   : > { %v704_v43 = vpop.f32.mrb[3].mxu0  ;;  %v711_v45 = vsel %vm710_vm1, %v706_v34, %v708_v35  ;;  %v885_v46 = vpop.f32.mrb[3].mxu1  ;;  %v891_v48 = vsel %vm710_vm1, %v887_v38, %v889_v39 }
 0x11c   : > { %v713_v47 = vsel %vm712_vm2, %v711_v45, 0.0  ;;  %v892_v50 = vsel %vm712_vm2, %v891_v48, 0.0 }
 0x11d   : > { %v714_v49 = vadd.f32 %v713_v47, %v559_v42  ;;  %v893_v51 = vadd.f32 %v892_v50, %v559_v42 }
 0x11f   : > { %v716_v52 = vsel %vm715_vm3, %v714_v49, 0.0  ;;  %v894_v53 = vsel %vm715_vm3, %v893_v51, 0.0 }
 0x120   : > { %717 = vadd.xlane.f32.xlu0 %v716_v52 }
 0x124   : > { %895 = vadd.xlane.f32.xlu0 %v894_v53 }
 0x1ad   : > { %v718_v54 = vpop.xlane.xlu0 %717 }
 0x1ae   : > { %v720_v55 = vmul.f32 0.03125, %v718_v54 }
 0x1b0   : > { %v721_v56 = vsub.f32 %v714_v49, %v720_v55 }
 0x1b1   : > { %v896_v57 = vpop.xlane.xlu0 %895 }
 0x1b2   : > { %v897_v58 = vmul.f32 0.03125, %v896_v57  ;;  %v722_v59 = vmul.f32 %v721_v56, %v721_v56 }
 0x1b4   : > { %v898_v60 = vsub.f32 %v893_v51, %v897_v58  ;;  %v723_v61 = vsel %vm715_vm3, %v722_v59, 0.0 }
 0x1b5   : > { %724 = vadd.xlane.f32.xlu1 %v723_v61 }
 0x1b6   : > { %v899_v62 = vmul.f32 %v898_v60, %v898_v60 }
 0x1b8   : > { %v900_v63 = vsel %vm715_vm3, %v899_v62, 0.0 }
 0x1b9   : > { %901 = vadd.xlane.f32.xlu1 %v900_v63 }
 0x242   : > { %v725_v0 = vpop.xlane.xlu1 %724 }
 0x243   : > { %v726_v1 = vmul.f32 0.03125, %v725_v0 }
 0x245   : > { %v727_v2 = vadd.f32 1e-05, %v726_v1 }
 0x246   : > { %v902_v3 = vpop.xlane.xlu1 %901 }
 0x247   : > { %2892 = vrsqrt.f32 %v727_v2  ;;  %v903_v4 = vmul.f32 0.03125, %v902_v3 }
 0x249   : > { %v904_v5 = vadd.f32 1e-05, %v903_v4 }
 0x24b   : > { %2894 = vrsqrt.f32 %v904_v5 }
 0x251   : > { %v2893_v6 = vpop.eup %2892 }
 0x252   : > { %v729_v8 = vmul.f32 %v2893_v6, %v721_v56 }
 0x254   : > { %v734_v10 = vmul.f32 %v2539_v7, %v729_v8 }
 0x255   : > { %v2895_v11 = vpop.eup %2894 }
 0x256   : > { %v739_v12 = vadd.f32 %v2540_v9, %v734_v10  ;;  %v906_v13 = vmul.f32 %v2895_v11, %v898_v60 }
 0x258   : > { %740 = vst.msk [vmem:[#allocation2] sm:$0xff] %vm715_vm3, %v739_v12  ;;  %v907_v14 = vmul.f32 %v2539_v7, %v906_v13 }
 0x25a   : > { %v908_v15 = vadd.f32 %v2540_v9, %v907_v14 }
 0x25c   : > { %910 = vst.msk [vmem:[#allocation2 + $0x8] sm:$0xff] %vm715_vm3, %v908_v15 }
 0x25d PF: > { %vm914_vm4 = vcmask 261120   ;;  %v2911_v30 = vld [vmem:[%s3187_s21] sm:$0xff]   ;;  %v3064_v31 = vmov 0.0   ;;  %v2912_v32 = vld [vmem:[%s3187_s21 + $0x8] sm:$0xff]   ;;  %vm3065_vm5 = vmmov 0   ;;  %v942_v37 = vlaneseq  ;;  %s3067_s21 = smov 64  }
 0x25e   : > { %2659 = vmatprep.subr.bf16.mxu0 %v3064_v31  ;;  %2679 = vmatprep.subr.bf16.mxu1 %v3064_v31  ;;  %v3356_v42 = vld [vmem:[%s3182_s18] sm:$0xff]  ;;  %s3066_s18 = smov 96   ;;  %vm1028_vm6 = vcmask 64512   ;;  %s3068_s28 = smov 88   ;;  %vm1153_vm8 = vcmask 1043456   ;;  %vm1939_vm9 = vcmask 130048  }
 0x25f   : > { %v3330_v16 = vld [vmem:[#allocation2] sm:$0xff]  ;;  %2660 = vmatpush3.bf16.msra.mxu0 %v2911_v30  ;;  %2663 = vmatprep.mubr.msk.bf16.mxu0 %vm3065_vm5, %v3064_v31  ;;  %v3352_v40 = vshrl.u32 %v942_v37, 7  ;;  %v1020_v5 = vand.u32 127, %v942_v37  ;;  %s3069_s29 = smov 120   ;;  %s3070_s12 = smov 56   ;;  %vm1942_vm10 = vcmask 195584  }
 0x260   : > { %v915_v18 = vsel %vm914_vm4, %v3330_v16, 0.0  ;;  %2661 = vmatprep.subr.bf16.mxu0 %v3064_v31  ;;  %2681 = vmatprep.mubr.msk.bf16.mxu1 %vm3065_vm5, %v3064_v31  ;;  %s3071_s13 = smov 80   ;;  %s3072_s30 = smov 112  }
 0x261   : > { %916 = vadd.xlane.f32.xlu0 %v915_v18  ;;  %v944_v41 = vsub.s32 0, %v3352_v40  ;;  %v950_v46 = vsub.s32 1, %v3352_v40  ;;  %v961_v55 = vsub.s32 6, %v3352_v40  ;;  %vm1021_vm7 = vcmp.ge.s32.totalorder %v1020_v5, 5  ;;  %s3073_s15 = smov 48   ;;  %s3074_s20 = smov 72  }
 0x262   : > { %v3385_v6 = vsel %vm1021_vm7, -1e+30, %v3064_v31  ;;  %s3075_s22 = smov 104   ;;  %s3076_s23 = smov 40  }
 0x263   : > { %v3332_v17 = vld [vmem:[#allocation2 + $0x8] sm:$0xff]  ;;  %2662 = vmatpush3.bf16.msra.mxu0 %v2912_v32  ;;  %v945_v45 = vrot.slane %v3356_v42, %v944_v41  ;;  %v951_v50 = vrot.slane %v3356_v42, %v950_v46  ;;  %v962_v56 = vrot.slane %v3356_v42, %v961_v55  ;;  %s3077_s16 = smov 8   ;;  %s3078_s17 = smov 16  }
 0x264   : > { %v918_v19 = vsel %vm914_vm4, %v3332_v17, 0.0  ;;  %2667 = vmatprep.subr.bf16.mxu0 %v3064_v31  ;;  %s3079_s19 = smov 24   ;;  %p2590_p6 = scmp.ne.s32.totalorder %s3053_s25, 1 }
 0x265   : > { %919 = vadd.xlane.f32.xlu0 %v918_v19  ;;  %vm3081_vm11 = vmmov (!%p2590_p6), 0   ;;  %vm2354_vm12 = vcmask (!%p2590_p6), 57344  }
 0x2ee   : > { %v917_v20 = vpop.xlane.xlu0 %916 }
 0x2ef   : > { %v922_v21 = vmul.f32 0.03125, %v917_v20 }
 0x2f1   : > { %v924_v22 = vsub.f32 %v3330_v16, %v922_v21 }
 0x2f2   : > { %v920_v23 = vpop.xlane.xlu0 %919 }
 0x2f3   : > { %v923_v24 = vmul.f32 0.03125, %v920_v23  ;;  %v926_v25 = vmul.f32 %v924_v22, %v924_v22 }
 0x2f5   : > { %v925_v26 = vsub.f32 %v3332_v17, %v923_v24  ;;  %v928_v27 = vsel %vm914_vm4, %v926_v25, 0.0 }
 0x2f6   : > { %929 = vadd.xlane.f32.xlu1 %v928_v27 }
 0x2f7   : > { %v927_v28 = vmul.f32 %v925_v26, %v925_v26 }
 0x2f9   : > { %v931_v29 = vsel %vm914_vm4, %v927_v28, 0.0 }
 0x2fa   : > { %932 = vadd.xlane.f32.xlu1 %v931_v29 }
 0x383   : > { %v930_v33 = vpop.xlane.xlu1 %929 }
 0x384   : > { %v934_v34 = vmul.f32 0.03125, %v930_v33 }
 0x386   : > { %v936_v35 = vadd.f32 1e-05, %v934_v34 }
 0x387   : > { %v933_v36 = vpop.xlane.xlu1 %932 }
 0x388   : > { %2925 = vrsqrt.f32 %v936_v35  ;;  %v935_v38 = vmul.f32 0.03125, %v933_v36 }
 0x38a   : > { %v937_v39 = vadd.f32 1e-05, %v935_v38 }
 0x38c   : > { %2927 = vrsqrt.f32 %v937_v39 }
 0x392   : > { %v2926_v43 = vpop.eup %2925 }
 0x393   : > { %v940_v44 = vmul.f32 %v2926_v43, %v924_v22 }
 0x395   : > { %v946_v49 = vmul.f32 %v945_v45, %v940_v44 }
 0x396   : > { %v2928_v47 = vpop.eup %2927 }
 0x397   : > { %v941_v48 = vmul.f32 %v2928_v47, %v925_v26  ;;  %v952_v52 = vadd.f32 %v951_v50, %v946_v49 }
 0x399   : > { %v947_v51 = vmul.f32 %v945_v45, %v941_v48 }
 0x39b   : > { %v953_v53 = vadd.f32 %v951_v50, %v947_v51 }
 0x39d   : > { %v954_v54 = vpack.c.bf16 %v953_v53, %v952_v52 }
 0x39f   : > { %2664 = vmatmul.mubr.msk.bf16.vlgmr.msra.gmra.mrb[0].mxu0 %vm914_vm4, %v954_v54 }
 0x3a0   : > { %2669 = vmatprep.mubr.msk.bf16.mxu0 %vm3065_vm5, %v3064_v31 }
 0x472   : > { %v1012_v57 = vpop.f32.mrb[0].mxu0 }
 0x473   : > { %v1013_v58 = vadd.f32 %v1012_v57, %v962_v56  ;;  %v2665_v59 = vpop.f32.mrb[1].mxu0 }
 0x474   : > { %v1015_v60 = vpop.f32.mrb[2].mxu0 }
 0x475   : > { %v3366_v61 = vpack.c.bf16 %v1013_v58, %v1013_v58  ;;  %v1016_v62 = vadd.f32 %v1015_v60, %v962_v56  ;;  %v2666_v63 = vpop.f32.mrb[3].mxu0 }
 0x477   : > { %v3368_v0 = vpack.c.bf16 %v1016_v62, %v1016_v62  ;;  %1026 = vrot.lane.b32.xlu0 %v3366_v61, %s3066_s18 }
 0x479   : > { %1076 = vrot.lane.b32.xlu1 %v3368_v0, %s3066_s18 }
 0x4e9   : > { %v1027_v1 = vpop.permute.xlu0 %1026 }
 0x4ea   : > { %v1033_v2 = vsel %vm1028_vm6, %v1027_v1, 0 }
 0x4eb   : > { %2668 = vmatpush3.bf16.xpose.msra.mxu0 %v1033_v2  ;;  %v1077_v3 = vpop.permute.xlu1 %1076 }
 0x4ec   : > { %2673 = vmatprep.subr.bf16.mxu0 %v3064_v31  ;;  %v1082_v4 = vsel %vm1028_vm6, %v1077_v3, 0 }
 0x4f2   : > { %2670 = vmatmul.mubr.msk.bf16.vlgmr.msra.gmra.mrb[4].mxu0 %vm1028_vm6, %v3366_v61 }
 0x4f3   : > { %2674 = vmatpush3.bf16.xpose.msra.mxu0 %v1082_v4  ;;  %2675 = vmatprep.mubr.msk.bf16.mxu0 %vm3065_vm5, %v3064_v31 }
 0x4f4   : > { %2685 = vmatprep.subr.bf16.mxu0 %v3064_v31 }
 0x4fa   : > { %2676 = vmatmul.mubr.msk.bf16.vlgmr.msra.gmra.mrb[8].mxu0 %vm1028_vm6, %v3368_v0 }
 0x4fb   : > { %2687 = vmatprep.mubr.msk.bf16.mxu0 %vm3065_vm5, %v3064_v31 }
 0x5c5   : > { %v1069_v7 = vpop.f32.mrb[4].mxu0 }
 0x5c6   : > { %v1070_v8 = vadd.f32 %v1069_v7, %v3385_v6  ;;  %v2671_v9 = vpop.f32.mrb[5].mxu0 }
 0x5c7   : > { %v1072_v10 = vpop.f32.mrb[6].mxu0 }
 0x5c8   : > { %v2672_v11 = vpop.f32.mrb[7].mxu0  ;;  %v1124_v12 = vsel %vm1028_vm6, %v1070_v8, -inf }
 0x5c9   : > { %1125 = vmax.xlane.f32.xlu1 %v1124_v12 }
 0x5cd   : > { %v1118_v13 = vpop.f32.mrb[8].mxu0 }
 0x5ce   : > { %v1119_v14 = vadd.f32 %v1118_v13, %v3385_v6  ;;  %v2677_v15 = vpop.f32.mrb[9].mxu0 }
 0x5cf   : > { %v1121_v18 = vpop.f32.mrb[10].mxu0 }
 0x5d0   : > { %v2678_v19 = vpop.f32.mrb[11].mxu0  ;;  %v1127_v20 = vsel %vm1028_vm6, %v1119_v14, -inf }
 0x5d1   : > { %1128 = vmax.xlane.f32.xlu0 %v1127_v20 }
 0x5da   : > { %1197 = vrot.lane.b32.xlu1 %v3368_v0, %s3067_s21 }
 0x5de   : > { %1249 = vrot.lane.b32.xlu1 %v3366_v61, %s3068_s28 }
 0x656   : > { %v1126_v21 = vpop.xlane.xlu1 %1125 }
 0x657   : > { %v1130_v22 = vsub.f32 %v1070_v8, %v1126_v21 }
 0x659   : > { %v1132_v23 = vmul.f32 1.442695, %v1130_v22 }
 0x65a   : > { %v1198_v24 = vpop.permute.xlu1 %1197 }
 0x65b   : > { %2929 = vpow2.f32 %v1132_v23  ;;  %v1203_v25 = vsel %vm1153_vm8, %v1198_v24, 0 }
 0x65c   : > { %2686 = vmatpush3.bf16.msra.mxu0 %v1203_v25 }
 0x65d   : > { %2697 = vmatprep.subr.bf16.mxu0 %v3064_v31 }
 0x65e   : > { %v1129_v26 = vpop.xlane.xlu0 %1128  ;;  %v1250_v35 = vpop.permute.xlu1 %1249 }
 0x65f   : > { %v1131_v27 = vsub.f32 %v1119_v14, %v1129_v26  ;;  %v1255_v44 = vsel %vm1028_vm6, %v1250_v35, 0 }
 0x661   : > { %v1134_v28 = vmul.f32 1.442695, %v1131_v27 }
 0x663   : > { %2931 = vpow2.f32 %v1134_v28 }
 0x665   : > { %v2930_v29 = vpop.eup %2929 }
 0x666   : > { %v1136_v30 = vsel %vm1028_vm6, %v2930_v29, 0.0 }
 0x667   : > { %1137 = vadd.xlane.f32.xlu0 %v1136_v30 }
 0x66d   : > { %v2932_v32 = vpop.eup %2931 }
 0x66e   : > { %v1139_v33 = vsel %vm1028_vm6, %v2932_v32, 0.0 }
 0x66f   : > { %1140 = vadd.xlane.f32.xlu1 %v1139_v33 }
 0x67d   : > { %1148 = vrot.lane.b32.xlu0 %v3366_v61, %s3067_s21 }
 0x680   : > { %1299 = vrot.lane.b32.xlu1 %v3368_v0, %s3068_s28 }
 0x681   : > { %1247 = vrot.lane.b32.xlu0 %v3366_v61, %s3069_s29 }
 0x684   : > { %1297 = vrot.lane.b32.xlu1 %v3368_v0, %s3069_s29 }
 0x6f4   : > { %v1138_v34 = vpop.xlane.xlu0 %1137 }
 0x6f5   : > { %2933 = vrcp.f32 %v1138_v34 }
 0x6f8   : > { %v1149_v36 = vpop.permute.xlu0 %1148 }
 0x6f9   : > { %v1155_v37 = vsel %vm1153_vm8, %v1149_v36, 0 }
 0x6fa   : > { %2680 = vmatpush3.bf16.msra.mxu1 %v1155_v37 }
 0x6fb   : > { %2691 = vmatprep.subr.bf16.mxu1 %v3064_v31 }
 0x6fc   : > { %v1141_v38 = vpop.xlane.xlu1 %1140  ;;  %v1248_v49 = vpop.permute.xlu0 %1247 }
 0x6fd   : > { %2935 = vrcp.f32 %v1141_v38 }
 0x6ff   : > { %v2934_v39 = vpop.eup %2933 }
 0x700   : > { %v3403_v41 = vmul.f32 %v2934_v39, %v2930_v29  ;;  %v1300_v47 = vpop.permute.xlu1 %1299 }
 0x701   : > { %v1305_v50 = vsel %vm1028_vm6, %v1300_v47, 0 }
 0x702   : > { %v1146_v43 = vpack.c.bf16 %v3403_v41, %v3403_v41 }
 0x704   : > { %2682 = vmatmul.mubr.msk.bf16.vlgmr.msra.gmra.mrb[0].mxu1 %vm1028_vm6, %v1146_v43  ;;  %v1298_v51 = vpop.permute.xlu1 %1297 }
 0x705   : > { %2692 = vmatpush3.bf16.xpose.msra.mxu1 %v1255_v44  ;;  %2693 = vmatprep.mubr.msk.bf16.mxu1 %vm3065_vm5, %v3064_v31 }
 0x706   : > { %2703 = vmatprep.subr.bf16.mxu1 %v3064_v31 }
 0x707   : > { %v2936_v45 = vpop.eup %2935 }
 0x708   : > { %v3412_v46 = vmul.f32 %v2936_v45, %v2932_v32 }
 0x70a   : > { %v1147_v48 = vpack.c.bf16 %v3412_v46, %v3412_v46 }
 0x70c   : > { %2688 = vmatmul.mubr.msk.bf16.vlgmr.msra.gmra.mrb[12].mxu0 %vm1028_vm6, %v1147_v48  ;;  %2694 = vmatmul.mubr.msk.bf16.vlgmr.msra.gmra.mrb[4].mxu1 %vm1028_vm6, %v1248_v49 }
 0x70d   : > { %2698 = vmatpush3.bf16.xpose.msra.mxu0 %v1305_v50  ;;  %2699 = vmatprep.mubr.msk.bf16.mxu0 %vm3065_vm5, %v3064_v31 }
 0x70e   : > { %2709 = vmatprep.subr.bf16.mxu0 %v3064_v31  ;;  %2705 = vmatprep.mubr.msk.bf16.mxu1 %vm3065_vm5, %v3064_v31 }
 0x714   : > { %2700 = vmatmul.mubr.msk.bf16.vlgmr.msra.gmra.mrb[16].mxu0 %vm1028_vm6, %v1298_v51 }
 0x715   : > { %2711 = vmatprep.mubr.msk.bf16.mxu0 %vm3065_vm5, %v3064_v31 }
 0x7d7   : > { %v3427_v52 = vpop.f32.mrb[0].mxu1 }
 0x7d8   : > { %v2683_v53 = vpop.f32.mrb[1].mxu1 }
 0x7d9   : > { %v1194_v54 = vpop.f32.mrb[2].mxu1 }
 0x7da   : > { %v2684_v55 = vpop.f32.mrb[3].mxu1 }
 0x7df   : > { %v3429_v56 = vpop.f32.mrb[12].mxu0  ;;  %v1291_v57 = vpop.f32.mrb[4].mxu1 }
 0x7e0   : > { %v1292_v58 = vadd.f32 %v1291_v57, %v3385_v6  ;;  %v2689_v59 = vpop.f32.mrb[13].mxu0  ;;  %v2695_v60 = vpop.f32.mrb[5].mxu1 }
 0x7e1   : > { %v1242_v62 = vpop.f32.mrb[14].mxu0  ;;  %v1294_v63 = vpop.f32.mrb[6].mxu1 }
 0x7e2   : > { %v2690_v1 = vpop.f32.mrb[15].mxu0  ;;  %v2696_v2 = vpop.f32.mrb[7].mxu1  ;;  %v1347_v3 = vsel %vm1028_vm6, %v1292_v58, -inf }
 0x7e3   : > { %1348 = vmax.xlane.f32.xlu0 %v1347_v3 }
 0x7e7   : > { %v1341_v4 = vpop.f32.mrb[16].mxu0 }
 0x7e8   : > { %v1342_v5 = vadd.f32 %v1341_v4, %v3385_v6  ;;  %v2701_v7 = vpop.f32.mrb[17].mxu0 }
 0x7e9   : > { %v1344_v8 = vpop.f32.mrb[18].mxu0 }
 0x7ea   : > { %v2702_v9 = vpop.f32.mrb[19].mxu0  ;;  %v1350_v10 = vsel %vm1028_vm6, %v1342_v5, -inf }
 0x7eb   : > { %1351 = vmax.xlane.f32.xlu1 %v1350_v10 }
 0x7fc   : > { %1419 = vrot.lane.b32.xlu1 %v3368_v0, %s3070_s12 }
 0x800   : > { %1471 = vrot.lane.b32.xlu1 %v3366_v61, %s3071_s13 }
 0x804   : > { %1521 = vrot.lane.b32.xlu1 %v3368_v0, %s3071_s13 }
 0x808   : > { %1519 = vrot.lane.b32.xlu1 %v3368_v0, %s3072_s30 }
 0x870   : > { %v1349_v11 = vpop.xlane.xlu0 %1348 }
 0x871   : > { %v1353_v12 = vsub.f32 %v1292_v58, %v1349_v11 }
 0x873   : > { %v1355_v13 = vmul.f32 1.442695, %v1353_v12 }
 0x875   : > { %2937 = vpow2.f32 %v1355_v13 }
 0x878   : > { %v1352_v14 = vpop.xlane.xlu1 %1351 }
 0x879   : > { %v1354_v15 = vsub.f32 %v1342_v5, %v1352_v14 }
 0x87b   : > { %v1357_v18 = vmul.f32 1.442695, %v1354_v15 }
 0x87c   : > { %v1420_v19 = vpop.permute.xlu1 %1419 }
 0x87d   : > { %2939 = vpow2.f32 %v1357_v18  ;;  %v1425_v20 = vsel %vm1153_vm8, %v1420_v19, 0 }
 0x87e   : > { %2710 = vmatpush3.bf16.msra.mxu0 %v1425_v20 }
 0x87f   : > { %v2938_v21 = vpop.eup %2937  ;;  %2721 = vmatprep.subr.bf16.mxu0 %v3064_v31 }
 0x880   : > { %v1359_v22 = vsel %vm1028_vm6, %v2938_v21, 0.0  ;;  %v1472_v33 = vpop.permute.xlu1 %1471 }
 0x881   : > { %1360 = vadd.xlane.f32.xlu0 %v1359_v22  ;;  %v1477_v37 = vsel %vm1028_vm6, %v1472_v33, 0 }
 0x884   : > { %v1522_v36 = vpop.permute.xlu1 %1521 }
 0x885   : > { %v1527_v39 = vsel %vm1028_vm6, %v1522_v36, 0 }
 0x887   : > { %v2940_v23 = vpop.eup %2939 }
 0x888   : > { %v1362_v24 = vsel %vm1028_vm6, %v2940_v23, 0.0  ;;  %v1520_v44 = vpop.permute.xlu1 %1519 }
 0x889   : > { %1363 = vadd.xlane.f32.xlu0 %v1362_v24 }
 0x89f   : > { %1371 = vrot.lane.b32.xlu0 %v3366_v61, %s3070_s12 }
 0x8a3   : > { %1469 = vrot.lane.b32.xlu0 %v3366_v61, %s3072_s30 }
 0x90e   : > { %v1361_v25 = vpop.xlane.xlu0 %1360 }
 0x90f   : > { %2941 = vrcp.f32 %v1361_v25 }
 0x916   : > { %v1364_v26 = vpop.xlane.xlu0 %1363 }
 0x917   : > { %2943 = vrcp.f32 %v1364_v26 }
 0x919   : > { %v2942_v27 = vpop.eup %2941 }
 0x91a   : > { %v3445_v28 = vmul.f32 %v2942_v27, %v2938_v21  ;;  %v1372_v29 = vpop.permute.xlu0 %1371 }
 0x91b   : > { %v1377_v30 = vsel %vm1153_vm8, %v1372_v29, 0 }
 0x91c   : > { %2704 = vmatpush3.bf16.msra.mxu1 %v1377_v30  ;;  %v1369_v32 = vpack.c.bf16 %v3445_v28, %v3445_v28  ;;  %v1467_v29 = vadd.f32 %v3445_v28, %v3403_v41 }
 0x91d   : > { %2715 = vmatprep.subr.bf16.mxu1 %v3064_v31 }
 0x91e   : > { %v1470_v43 = vpop.permute.xlu0 %1469 }
 0x91f   : > { %2706 = vmatmul.mubr.msk.bf16.vlgmr.msra.gmra.mrb[8].mxu1 %vm1028_vm6, %v1369_v32 }
 0x920   : > { %2717 = vmatprep.mubr.msk.bf16.mxu1 %vm3065_vm5, %v3064_v31 }
 0x921   : > { %v2944_v34 = vpop.eup %2943 }
 0x922   : > { %v3454_v35 = vmul.f32 %v2944_v34, %v2940_v23 }
 0x924   : > { %v1370_v38 = vpack.c.bf16 %v3454_v35, %v3454_v35  ;;  %v1468_v36 = vadd.f32 %v3454_v35, %v3412_v46 }
 0x925   : > { %2716 = vmatpush3.bf16.xpose.msra.mxu1 %v1477_v37 }
 0x926   : > { %2712 = vmatmul.mubr.msk.bf16.vlgmr.msra.gmra.mrb[20].mxu0 %vm1028_vm6, %v1370_v38  ;;  %2727 = vmatprep.subr.bf16.mxu1 %v3064_v31 }
 0x927   : > { %2722 = vmatpush3.bf16.xpose.msra.mxu0 %v1527_v39  ;;  %2723 = vmatprep.mubr.msk.bf16.mxu0 %vm3065_vm5, %v3064_v31 }
 0x928   : > { %2733 = vmatprep.subr.bf16.mxu0 %v3064_v31 }
 0x92c   : > { %2718 = vmatmul.mubr.msk.bf16.vlgmr.msra.gmra.mrb[12].mxu1 %vm1028_vm6, %v1470_v43 }
 0x92d   : > { %2729 = vmatprep.mubr.msk.bf16.mxu1 %vm3065_vm5, %v3064_v31 }
 0x92e   : > { %2724 = vmatmul.mubr.msk.bf16.vlgmr.msra.gmra.mrb[24].mxu0 %vm1028_vm6, %v1520_v44 }
 0x92f   : > { %2735 = vmatprep.mubr.msk.bf16.mxu0 %vm3065_vm5, %v3064_v31 }
 0x9f2   : > { %v3471_v45 = vpop.f32.mrb[8].mxu1 }
 0x9f3   : > { %v2707_v47 = vpop.f32.mrb[9].mxu1 }
 0x9f4   : > { %v1416_v48 = vpop.f32.mrb[10].mxu1 }
 0x9f5   : > { %v2708_v49 = vpop.f32.mrb[11].mxu1 }
 0x9f9   : > { %v3473_v50 = vpop.f32.mrb[20].mxu0 }
 0x9fa   : > { %v2896_v51 = vpack.i.bf16 %v3473_v50, %v3471_v45  ;;  %v2713_v53 = vpop.f32.mrb[21].mxu0 }
 0x9fb   : > { %v1464_v54 = vpop.f32.mrb[22].mxu0 }
 0x9fc   : > { %v2714_v55 = vpop.f32.mrb[23].mxu0 }
 0x9ff   : > { %v1513_v57 = vpop.f32.mrb[12].mxu1 }
 0xa00   : > { %v1514_v58 = vadd.f32 %v1513_v57, %v3385_v6  ;;  %v2719_v59 = vpop.f32.mrb[13].mxu1 }
 0xa01   : > { %v1516_v60 = vpop.f32.mrb[14].mxu1  ;;  %v1563_v62 = vpop.f32.mrb[24].mxu0 }
 0xa02   : > { %v1564_v63 = vadd.f32 %v1563_v62, %v3385_v6  ;;  %v2720_v1 = vpop.f32.mrb[15].mxu1  ;;  %v2725_v2 = vpop.f32.mrb[25].mxu0  ;;  %v1569_v3 = vsel %vm1028_vm6, %v1514_v58, -inf }
 0xa03   : > { %1570 = vmax.xlane.f32.xlu0 %v1569_v3  ;;  %v1566_v4 = vpop.f32.mrb[26].mxu0 }
 0xa04   : > { %v2726_v5 = vpop.f32.mrb[27].mxu0  ;;  %v1572_v7 = vsel %vm1028_vm6, %v1564_v63, -inf }
 0xa05   : > { %1573 = vmax.xlane.f32.xlu1 %v1572_v7 }
 0xa16   : > { %1641 = vrot.lane.b32.xlu1 %v3368_v0, %s3073_s15 }
 0xa1a   : > { %1693 = vrot.lane.b32.xlu1 %v3366_v61, %s3074_s20 }
 0xa1e   : > { %1743 = vrot.lane.b32.xlu1 %v3368_v0, %s3074_s20 }
 0xa22   : > { %1741 = vrot.lane.b32.xlu1 %v3368_v0, %s3075_s22 }
 0xa90   : > { %v1571_v8 = vpop.xlane.xlu0 %1570 }
 0xa91   : > { %v1575_v9 = vsub.f32 %v1514_v58, %v1571_v8 }
 0xa92   : > { %v1574_v10 = vpop.xlane.xlu1 %1573 }
 0xa93   : > { %v1577_v11 = vmul.f32 1.442695, %v1575_v9  ;;  %v1576_v12 = vsub.f32 %v1564_v63, %v1574_v10 }
 0xa95   : > { %2945 = vpow2.f32 %v1577_v11  ;;  %v1579_v13 = vmul.f32 1.442695, %v1576_v12 }
 0xa96   : > { %v1642_v14 = vpop.permute.xlu1 %1641 }
 0xa97   : > { %2947 = vpow2.f32 %v1579_v13  ;;  %v1647_v15 = vsel %vm1153_vm8, %v1642_v14, 0 }
 0xa98   : > { %2734 = vmatpush3.bf16.msra.mxu0 %v1647_v15 }
 0xa99   : > { %2745 = vmatprep.subr.bf16.mxu0 %v3064_v31 }
 0xa9a   : > { %v1694_v27 = vpop.permute.xlu1 %1693 }
 0xa9b   : > { %v1699_v39 = vsel %vm1028_vm6, %v1694_v27, 0 }
 0xa9e   : > { %v1744_v38 = vpop.permute.xlu1 %1743 }
 0xa9f   : > { %v2946_v18 = vpop.eup %2945  ;;  %v1749_v28 = vsel %vm1028_vm6, %v1744_v38, 0 }
 0xaa0   : > { %v1581_v19 = vsel %vm1028_vm6, %v2946_v18, 0.0 }
 0xaa1   : > { %v2948_v20 = vpop.eup %2947  ;;  %1582 = vadd.xlane.f32.xlu0 %v1581_v19 }
 0xaa2   : > { %v1584_v21 = vsel %vm1028_vm6, %v2948_v20, 0.0  ;;  %v1742_v35 = vpop.permute.xlu1 %1741 }
 0xaa5   : > { %1585 = vadd.xlane.f32.xlu0 %v1584_v21 }
 0xabb   : > { %1593 = vrot.lane.b32.xlu0 %v3366_v61, %s3073_s15 }
 0xabf   : > { %1691 = vrot.lane.b32.xlu0 %v3366_v61, %s3075_s22 }
 0xb2e   : > { %v1583_v22 = vpop.xlane.xlu0 %1582 }
 0xb2f   : > { %2949 = vrcp.f32 %v1583_v22 }
 0xb32   : > { %v1586_v23 = vpop.xlane.xlu0 %1585 }
 0xb33   : > { %2951 = vrcp.f32 %v1586_v23 }
 0xb36   : > { %v1594_v24 = vpop.permute.xlu0 %1593 }
 0xb37   : > { %v1599_v25 = vsel %vm1153_vm8, %v1594_v24, 0 }
 0xb38   : > { %2728 = vmatpush3.bf16.msra.mxu1 %v1599_v25 }
 0xb39   : > { %v2950_v26 = vpop.eup %2949  ;;  %2739 = vmatprep.subr.bf16.mxu1 %v3064_v31 }
 0xb3a   : > { %v1588_v30 = vmul.f32 %v2950_v26, %v2946_v18  ;;  %v1692_v46 = vpop.permute.xlu0 %1691 }
 0xb3c   : > { %v3495_v32 = vadd.f32 %v1588_v30, %v1467_v29  ;;  %v1591_v33 = vpack.c.bf16 %v1588_v30, %v1588_v30 }
 0xb3d   : > { %v2952_v34 = vpop.eup %2951 }
 0xb3e   : > { %v1590_v37 = vmul.f32 %v2952_v34, %v2948_v20  ;;  %2730 = vmatmul.mubr.msk.bf16.vlgmr.msra.gmra.mrb[16].mxu1 %vm1028_vm6, %v1591_v33  ;;  %v2913_v33 = vld [vmem:[%s3192_s24] sm:$0xff]  }
 0xb3f   : > { %2741 = vmatprep.mubr.msk.bf16.mxu1 %vm3065_vm5, %v3064_v31 }
 0xb40   : > { %v3503_v43 = vadd.f32 %v1590_v37, %v1468_v36  ;;  %v1592_v41 = vpack.c.bf16 %v1590_v37, %v1590_v37 }
 0xb41   : > { %2740 = vmatpush3.bf16.xpose.msra.mxu1 %v1699_v39 }
 0xb42   : > { %2736 = vmatmul.mubr.msk.bf16.vlgmr.msra.gmra.mrb[28].mxu0 %vm1028_vm6, %v1592_v41  ;;  %2751 = vmatprep.subr.bf16.mxu1 %v3064_v31 }
 0xb43   : > { %2746 = vmatpush3.bf16.xpose.msra.mxu0 %v1749_v28  ;;  %2747 = vmatprep.mubr.msk.bf16.mxu0 %vm3065_vm5, %v3064_v31 }
 0xb44   : > { %2757 = vmatprep.subr.bf16.mxu0 %v3064_v31 }
 0xb48   : > { %2742 = vmatmul.mubr.msk.bf16.vlgmr.msra.gmra.mrb[20].mxu1 %vm1028_vm6, %v1692_v46 }
 0xb49   : > { %2753 = vmatprep.mubr.msk.bf16.mxu1 %vm3065_vm5, %v3064_v31 }
 0xb4a   : > { %2748 = vmatmul.mubr.msk.bf16.vlgmr.msra.gmra.mrb[32].mxu0 %vm1028_vm6, %v1742_v35 }
 0xb4b   : > { %2759 = vmatprep.mubr.msk.bf16.mxu0 %vm3065_vm5, %v3064_v31 }
 0xc11   : > { %v1635_v44 = vpop.f32.mrb[16].mxu1 }
 0xc12   : > { %v2731_v47 = vpop.f32.mrb[17].mxu1 }
 0xc13   : > { %v1638_v48 = vpop.f32.mrb[18].mxu1 }
 0xc14   : > { %v2732_v49 = vpop.f32.mrb[19].mxu1 }
 0xc15   : > { %v1683_v53 = vpop.f32.mrb[28].mxu0 }
 0xc16   : > { %v2901_v54 = vpack.i.bf16 %v1683_v53, %v1635_v44  ;;  %v2737_v55 = vpop.f32.mrb[29].mxu0 }
 0xc17   : > { %v1686_v57 = vpop.f32.mrb[30].mxu0 }
 0xc18   : > { %v2738_v58 = vpop.f32.mrb[31].mxu0 }
 0xc1b   : > { %v1735_v59 = vpop.f32.mrb[20].mxu1 }
 0xc1c   : > { %v1736_v60 = vadd.f32 %v1735_v59, %v3385_v6  ;;  %v2743_v62 = vpop.f32.mrb[21].mxu1 }
 0xc1d   : > { %v1738_v63 = vpop.f32.mrb[22].mxu1  ;;  %v1785_v1 = vpop.f32.mrb[32].mxu0 }
 0xc1e   : > { %v1786_v2 = vadd.f32 %v1785_v1, %v3385_v6  ;;  %v2744_v3 = vpop.f32.mrb[23].mxu1  ;;  %v2749_v4 = vpop.f32.mrb[33].mxu0  ;;  %v1791_v5 = vsel %vm1028_vm6, %v1736_v60, -inf }
 0xc1f   : > { %1792 = vmax.xlane.f32.xlu0 %v1791_v5  ;;  %v1788_v7 = vpop.f32.mrb[34].mxu0  ;;  %v1952_v3 = vsub.s32 4, %v3352_v40 }
 0xc20   : > { %v2750_v8 = vpop.f32.mrb[35].mxu0  ;;  %v1794_v9 = vsel %vm1028_vm6, %v1786_v2, -inf }
 0xc21   : > { %1795 = vmax.xlane.f32.xlu1 %v1794_v9 }
 0xc32   : > { %1863 = vrot.lane.b32.xlu1 %v3368_v0, %s3076_s23 }
 0xc36   : > { %2897 = vrot.lane.b32.xlu1 %v2896_v51, %s3077_s16 }
 0xc3a   : > { %2902 = vrot.lane.b32.xlu1 %v2901_v54, %s3078_s17 }
 0xcac   : > { %v1793_v6 = vpop.xlane.xlu0 %1792 }
 0xcad   : > { %v1797_v10 = vsub.f32 %v1736_v60, %v1793_v6 }
 0xcae   : > { %v1796_v11 = vpop.xlane.xlu1 %1795 }
 0xcaf   : > { %v1799_v12 = vmul.f32 1.442695, %v1797_v10  ;;  %v1798_v13 = vsub.f32 %v1786_v2, %v1796_v11 }
 0xcb1   : > { %2953 = vpow2.f32 %v1799_v12  ;;  %v1801_v14 = vmul.f32 1.442695, %v1798_v13 }
 0xcb2   : > { %v1864_v15 = vpop.permute.xlu1 %1863 }
 0xcb3   : > { %2955 = vpow2.f32 %v1801_v14  ;;  %v1869_v0 = vsel %vm1153_vm8, %v1864_v15, 0 }
 0xcb4   : > { %2758 = vmatpush3.bf16.msra.mxu0 %v1869_v0 }
 0xcb5   : > { %2771 = vmatprep.subr.bf16.mxu0 %v3064_v31 }
 0xcb6   : > { %v2898_v35 = vpop.permute.xlu1 %2897 }
 0xcb7   : > { %v2900_v47 = vunpack.i.h.bf16 %v2898_v35  ;;  %v2899_v48 = vunpack.i.l.bf16 %v2898_v35  ;;  %v2917_v35 = vld [vmem:[%s3202_s14] sm:$0xff]  }
 0xcb9   : > { %v1938_v55 = vsel %vm1028_vm6, %v3429_v56, %v2900_v47  ;;  %v1937_v57 = vsel %vm1028_vm6, %v3427_v52, %v2899_v48  ;;  %v1953_v56 = vrot.slane %v3356_v42, %v1952_v3  ;;  %v2919_v47 = vld [vmem:[%s3202_s14 + $0x10] sm:$0xff]   ;;  %v2920_v48 = vld [vmem:[%s3202_s14 + $0x18] sm:$0xff]  }
 0xcba   : > { %v2903_v44 = vpop.permute.xlu1 %2902 }
 0xcbb   : > { %v2954_v18 = vpop.eup %2953  ;;  %v2905_v49 = vunpack.i.h.bf16 %v2903_v44  ;;  %v2904_v53 = vunpack.i.l.bf16 %v2903_v44  ;;  %v2918_v44 = vld [vmem:[%s3202_s14 + $0x8] sm:$0xff]  }
 0xcbc   : > { %v1803_v45 = vsel %vm1028_vm6, %v2954_v18, 0.0 }
 0xcbd   : > { %v2956_v50 = vpop.eup %2955  ;;  %1804 = vadd.xlane.f32.xlu0 %v1803_v45  ;;  %v1940_v60 = vsel %vm1939_vm9, %v1937_v57, %v2904_v53  ;;  %v1941_v62 = vsel %vm1939_vm9, %v1938_v55, %v2905_v49  ;;  %v2921_v49 = vld [vmem:[%s3202_s14 + $0x20] sm:$0xff]   ;;  %v2922_v53 = vld [vmem:[%s3202_s14 + $0x28] sm:$0xff]   ;;  %v2924_v55 = vld [vmem:[%s3202_s14 + $0x38] sm:$0xff]   ;;  %v2057_v57 = vsub.s32 7, %v3352_v40 }
 0xcbe   : > { %v1806_v51 = vsel %vm1028_vm6, %v2956_v50, 0.0 }
 0xcc1   : > { %1807 = vadd.xlane.f32.xlu0 %v1806_v51 }
 0xcd7   : > { %1815 = vrot.lane.b32.xlu0 %v3366_v61, %s3076_s23 }
 0xd4a   : > { %v1805_v19 = vpop.xlane.xlu0 %1804 }
 0xd4b   : > { %2957 = vrcp.f32 %v1805_v19  ;;  %v2915_v19 = vld [vmem:[%s3197_s26] sm:$0xff]  }
 0xd4e   : > { %v1808_v20 = vpop.xlane.xlu0 %1807 }
 0xd4f   : > { %2959 = vrcp.f32 %v1808_v20  ;;  %v2916_v20 = vld [vmem:[%s3197_s26 + $0x8] sm:$0xff]  }
 0xd52   : > { %v1816_v21 = vpop.permute.xlu0 %1815 }
 0xd53   : > { %v1821_v22 = vsel %vm1153_vm8, %v1816_v21, 0 }
 0xd54   : > { %2752 = vmatpush3.bf16.msra.mxu1 %v1821_v22 }
 0xd55   : > { %v2958_v23 = vpop.eup %2957  ;;  %2763 = vmatprep.subr.bf16.mxu1 %v3064_v31 }
 0xd56   : > { %v1810_v24 = vmul.f32 %v2958_v23, %v2954_v18 }
 0xd58   : > { %v3535_v25 = vadd.f32 %v1810_v24, %v3495_v32  ;;  %v1813_v26 = vpack.c.bf16 %v1810_v24, %v1810_v24  ;;  %v2914_v32 = vld [vmem:[%s3192_s24 + $0x8] sm:$0xff]  }
 0xd59   : > { %v2960_v27 = vpop.eup %2959 }
 0xd5a   : > { %v1812_v61 = vmul.f32 %v2960_v27, %v2956_v50  ;;  %2754 = vmatmul.mubr.msk.bf16.vlgmr.msra.gmra.mrb[24].mxu1 %vm1028_vm6, %v1813_v26 }
 0xd5b   : > { %2767 = vmatprep.mubr.msk.bf16.mxu1 %vm3065_vm5, %v3064_v31  ;;  %2764 = vmatpush3.bf16.msra.mxu1 %v2913_v33 }
 0xd5c   : > { %v3541_v29 = vadd.f32 %v1812_v61, %v3503_v43  ;;  %v1814_v30 = vpack.c.bf16 %v1812_v61, %v1812_v61  ;;  %2765 = vmatprep.subr.bf16.mxu1 %v3064_v31  ;;  %v2040_v61 = vsub.s32 2, %v3352_v40 }
 0xd5e   : > { %2760 = vmatmul.mubr.msk.bf16.vlgmr.msra.gmra.mrb[36].mxu0 %vm1028_vm6, %v1814_v30  ;;  %v2041_v33 = vrot.slane %v3356_v42, %v2040_v61 }
 0xd5f   : > { %2775 = vmatprep.mubr.msk.bf16.mxu0 %vm3065_vm5, %v3064_v31  ;;  %2766 = vmatpush3.bf16.msra.mxu1 %v2914_v32 }
 0xd60   : > { %2779 = vmatprep.subr.bf16.mxu1 %v3064_v31  ;;  %2772 = vmatpush3.bf16.msra.mxu0 %v2915_v19 }
 0xd61   : > { %2773 = vmatprep.subr.bf16.mxu0 %v3064_v31 }
 0xd64   : > { %2774 = vmatpush3.bf16.msra.mxu0 %v2916_v20 }
 0xe2d   : > { %v1857_v34 = vpop.f32.mrb[24].mxu1 }
 0xe2e   : > { %v2755_v36 = vpop.f32.mrb[25].mxu1 }
 0xe2f   : > { %v1860_v37 = vpop.f32.mrb[26].mxu1 }
 0xe30   : > { %v2756_v38 = vpop.f32.mrb[27].mxu1 }
 0xe31   : > { %v1905_v39 = vpop.f32.mrb[36].mxu0 }
 0xe32   : > { %v2906_v43 = vpack.i.bf16 %v1905_v39, %v1857_v34  ;;  %v2761_v41 = vpop.f32.mrb[37].mxu0  ;;  %v2046_v34 = vsub.s32 3, %v3352_v40 }
 0xe33   : > { %v1908_v28 = vpop.f32.mrb[38].mxu0 }
 0xe34   : > { %2907 = vrot.lane.b32.xlu0 %v2906_v43, %s3079_s19  ;;  %v2762_v46 = vpop.f32.mrb[39].mxu0  ;;  %v2047_v39 = vrot.slane %v3356_v42, %v2046_v34  ;;  %v2974_v34 = vld [vmem:[%s3701_s11 + $0x8] sm:$0xff] (!%p2590_p6)  }
 0xea6   : > { %v2908_v54 = vpop.permute.xlu0 %2907 }
 0xea7   : > { %v2910_v58 = vunpack.i.h.bf16 %v2908_v54  ;;  %v2909_v59 = vunpack.i.l.bf16 %v2908_v54  ;;  %v2923_v54 = vld [vmem:[%s3202_s14 + $0x30] sm:$0xff]  }
 0xea9   : > { %v1944_v63 = vsel %vm1942_vm10, %v1941_v62, %v2910_v58  ;;  %v1943_v1 = vsel %vm1942_vm10, %v1940_v60, %v2909_v59  ;;  %v2058_v58 = vrot.slane %v3356_v42, %v2057_v57 }
 0xeaa   : > { %v1945_v2 = vpack.c.bf16 %v1944_v63, %v1943_v1 }
 0xeac   : > { %2768 = vmatmul.mubr.msk.bf16.vlgmr.msra.gmra.mrb[28].mxu1 %vm914_vm4, %v1945_v2 }
 0xead   : > { %2795 = vmatprep.mubr.msk.bf16.mxu1 %vm3065_vm5, %v3064_v31  ;;  %2780 = vmatpush3.bf16.msra.mxu1 %v2917_v35  ;;  %v2591_v35 = vld [vmem:[%s3700_s10] ss:$0 sm:$0xff] (!%p2590_p6) }
 0xeae   : > { %2781 = vmatprep.subr.bf16.mxu1 %v3064_v31 }
 0xeb1   : > { %2782 = vmatpush3.bf16.msra.mxu1 %v2918_v44 }
 0xeb2   : > { %2783 = vmatprep.subr.bf16.mxu1 %v3064_v31 }
 0xeb5   : > { %2784 = vmatpush3.bf16.msra.mxu1 %v2919_v47 }
 0xeb6   : > { %2785 = vmatprep.subr.bf16.mxu1 %v3064_v31 }
 0xeb9   : > { %2786 = vmatpush3.bf16.msra.mxu1 %v2920_v48 }
 0xeba   : > { %2787 = vmatprep.subr.bf16.mxu1 %v3064_v31 }
 0xebd   : > { %2788 = vmatpush3.bf16.msra.mxu1 %v2921_v49  ;;  %v2592_v49 = vld [vmem:[%s3700_s10 + $0x1] ss:$0 sm:$0xff] (!%p2590_p6) }
 0xebe   : > { %2789 = vmatprep.subr.bf16.mxu1 %v3064_v31 }
 0xec1   : > { %2790 = vmatpush3.bf16.msra.mxu1 %v2922_v53 }
 0xec2   : > { %2791 = vmatprep.subr.bf16.mxu1 %v3064_v31 }
 0xec5   : > { %2792 = vmatpush3.bf16.msra.mxu1 %v2923_v54 }
 0xec6   : > { %2793 = vmatprep.subr.bf16.mxu1 %v3064_v31 }
 0xec9   : > { %2794 = vmatpush3.bf16.msra.mxu1 %v2924_v55 }
 0xf7f   : > { %v2003_v4 = vpop.f32.mrb[28].mxu1 }
 0xf80   : > { %v2004_v52 = vadd.f32 %v2003_v4, %v1953_v56  ;;  %v2769_v5 = vpop.f32.mrb[29].mxu1 }
 0xf81   : > { %v2006_v7 = vpop.f32.mrb[30].mxu1 }
 0xf82   : > { %v3562_v8 = vadd.f32 %v2004_v52, %v3330_v16  ;;  %v2007_v9 = vadd.f32 %v2006_v7, %v1953_v56  ;;  %v2770_v6 = vpop.f32.mrb[31].mxu1 }
 0xf84   : > { %v3565_v10 = vadd.f32 %v2007_v9, %v3332_v17  ;;  %v2012_v11 = vsel %vm914_vm4, %v3562_v8, 0.0 }
 0xf85   : > { %2013 = vadd.xlane.f32.xlu1 %v2012_v11 }
 0xf86   : > { %v2015_v12 = vsel %vm914_vm4, %v3565_v10, 0.0 }
 0xf87   : > { %2016 = vadd.xlane.f32.xlu0 %v2015_v12 }
0x1012   : > { %v2014_v13 = vpop.xlane.xlu1 %2013 }
0x1013   : > { %v2018_v14 = vmul.f32 0.03125, %v2014_v13 }
0x1014   : > { %v2017_v15 = vpop.xlane.xlu0 %2016 }
0x1015   : > { %v2020_v16 = vsub.f32 %v3562_v8, %v2018_v14  ;;  %v2019_v0 = vmul.f32 0.03125, %v2017_v15  ;;  %v2150_v15 = vsub.s32 5, %v3352_v40 }
0x1017   : > { %v2021_v18 = vsub.f32 %v3565_v10, %v2019_v0  ;;  %v2022_v17 = vmul.f32 %v2020_v16, %v2020_v16 }
0x1019   : > { %v2024_v45 = vsel %vm914_vm4, %v2022_v17, 0.0  ;;  %v2023_v50 = vmul.f32 %v2021_v18, %v2021_v18 }
0x101a   : > { %2025 = vadd.xlane.f32.xlu0 %v2024_v45 }
0x101b   : > { %v2027_v51 = vsel %vm914_vm4, %v2023_v50, 0.0 }
0x101e   : > { %2028 = vadd.xlane.f32.xlu0 %v2027_v51 }
0x10a7   : > { %v2026_v21 = vpop.xlane.xlu0 %2025 }
0x10a8   : > { %v2030_v22 = vmul.f32 0.03125, %v2026_v21 }
0x10aa   : > { %v2032_v23 = vadd.f32 1e-05, %v2030_v22 }
0x10ab   : > { %v2029_v24 = vpop.xlane.xlu0 %2028 }
0x10ac   : > { %2961 = vrsqrt.f32 %v2032_v23  ;;  %v2031_v26 = vmul.f32 0.03125, %v2029_v24 }
0x10ae   : > { %v2033_v27 = vadd.f32 1e-05, %v2031_v26 }
0x10b0   : > { %2963 = vrsqrt.f32 %v2033_v27 }
0x10b6   : > { %v2962_v30 = vpop.eup %2961 }
0x10b7   : > { %v2036_v32 = vmul.f32 %v2962_v30, %v2020_v16  ;;  %v2151_v16 = vrot.slane %v3356_v42, %v2150_v15 }
0x10b9   : > { %v2042_v37 = vmul.f32 %v2041_v33, %v2036_v32  ;;  %v3080_v32 = vmov (!%p2590_p6), 0.0  }
0x10ba   : > { %v2964_v36 = vpop.eup %2963  ;;  %2799 = vmatprep.subr.bf16.mxu0 (!%p2590_p6), %v3080_v32 }
0x10bb   : > { %v2037_v38 = vmul.f32 %v2964_v36, %v2021_v18  ;;  %v2048_v41 = vadd.f32 %v2047_v39, %v2042_v37 }
0x10bd   : > { %v2043_v43 = vmul.f32 %v2041_v33, %v2037_v38  ;;  %v2973_v33 = vld [vmem:[%s3701_s11] sm:$0xff] (!%p2590_p6)  }
0x10bf   : > { %v2049_v28 = vadd.f32 %v2047_v39, %v2043_v43 }
0x10c1   : > { %v2050_v46 = vpack.c.bf16 %v2049_v28, %v2048_v41 }
0x10c3   : > { %2776 = vmatmul.mubr.msk.bf16.vlgmr.msra.gmra.mrb[40].mxu0 %vm914_vm4, %v2050_v46 }
0x10c4   : > { %2803 = vmatprep.mubr.msk.bf16.mxu0 (!%p2590_p6), %vm3081_vm11, %v3080_v32  ;;  %2800 = vmatpush3.bf16.msra.mxu0 (!%p2590_p6), %v2973_v33 }
0x10c5   : > { %2801 = vmatprep.subr.bf16.mxu0 (!%p2590_p6), %v3080_v32 }
0x10c8   : > { %2802 = vmatpush3.bf16.msra.mxu0 (!%p2590_p6), %v2974_v34 }
0x1196   : > { %v2108_v59 = vpop.f32.mrb[40].mxu0 }
0x1197   : > { %v2109_v60 = vadd.f32 %v2108_v59, %v2058_v58  ;;  %v2777_v62 = vpop.f32.mrb[41].mxu0  ;;  %v2353_v59 = vmul.f32 (!%p2590_p6), 0.25, %v3541_v29 }
0x1198   : > { %v2111_v63 = vpop.f32.mrb[42].mxu0 }
0x1199   : > { %v2580_v1 = vmul.f32 -1.702, %v2109_v60  ;;  %v2112_v2 = vadd.f32 %v2111_v63, %v2058_v58  ;;  %v2778_v3 = vpop.f32.mrb[43].mxu0  ;;  %v2352_v58 = vmul.f32 (!%p2590_p6), 0.25, %v3535_v25  ;;  %2356 = vst.msk [vmem:[#allocation5 + $0x1] sm:$0x1] (!%p2590_p6), %vm2354_vm12, %v2353_v59 }
0x119b   : > { %v2119_v56 = vmul.f32 1.442695, %v2580_v1  ;;  %v2581_v4 = vmul.f32 -1.702, %v2112_v2  ;;  %2355 = vst.msk [vmem:[#allocation5] sm:$0x1] (!%p2590_p6), %vm2354_vm12, %v2352_v58 }
0x119d   : > { %2965 = vpow2.f32 %v2119_v56  ;;  %v2121_v52 = vmul.f32 1.442695, %v2581_v4 }
0x119f   : > { %2967 = vpow2.f32 %v2121_v52 }
0x11a7   : > { %v2966_v5 = vpop.eup %2965 }
0x11a8   : > { %v2123_v31 = vadd.f32 1.0, %v2966_v5 }
0x11a9   : > { %v2968_v7 = vpop.eup %2967 }
0x11aa   : > { %2969 = vrcp.f32 %v2123_v31  ;;  %v2124_v9 = vadd.f32 1.0, %v2968_v7 }
0x11ac   : > { %2971 = vrcp.f32 %v2124_v9 }
0x11b4   : > { %v2970_v6 = vpop.eup %2969 }
0x11b5   : > { %v2129_v12 = vmul.f32 %v2970_v6, %v2109_v60 }
0x11b6   : > { %v2972_v11 = vpop.eup %2971 }
0x11b7   : > { %v2130_v13 = vmul.f32 %v2972_v11, %v2112_v2 }
0x11b9   : > { %v2131_v14 = vpack.c.bf16 %v2130_v13, %v2129_v12 }
0x11bb   : > { %2796 = vmatmul.mubr.bf16.vlgmr.msra.gmra.mrb[32].mxu1 %v2131_v14 }
0x128e   : > { %v2234_v0 = vpop.f32.mrb[32].mxu1 }
0x128f   : > { %v2235_v18 = vadd.f32 %v2234_v0, %v2151_v16  ;;  %v2797_v17 = vpop.f32.mrb[33].mxu1  ;;  %2248 = sbr.rel (%p2590_p6) target bundleno = 5289 (0x14a9), region = 76 }
0x1290   : > { %v2237_v45 = vpop.f32.mrb[34].mxu1 }
0x1291   : > { %v2241_v50 = vadd.f32 %v2235_v18, %v3562_v8  ;;  %v2238_v51 = vadd.f32 %v2237_v45, %v2151_v16  ;;  %v2798_v19 = vpop.f32.mrb[35].mxu1 }
0x1293   : > { %2243 = vst.msk [vmem:[#allocation2] sm:$0xff] %vm914_vm4, %v2241_v50  ;;  %v2242_v20 = vadd.f32 %v2238_v51, %v3565_v10  ;;  %v2251_v40 = vsel (!%p2590_p6), %vm914_vm4, %v2241_v50, 0.0 }
0x1294   : > { %2252 = vadd.xlane.f32.xlu0 (!%p2590_p6), %v2251_v40 }
0x1295   : > { %2244 = vst.msk [vmem:[#allocation2 + $0x8] sm:$0xff] %vm914_vm4, %v2242_v20  ;;  %v2254_v42 = vsel (!%p2590_p6), %vm914_vm4, %v2242_v20, 0.0 }
0x1298   : > { %2255 = vadd.xlane.f32.xlu0 %v2254_v42 }
0x1321   : > { %v2253_v21 = vpop.xlane.xlu0 %2252 }
0x1322   : > { %v2257_v22 = vmul.f32 0.03125, %v2253_v21 }
0x1324   : > { %v2259_v8 = vsub.f32 %v2241_v50, %v2257_v22 }
0x1325   : > { %v2256_v23 = vpop.xlane.xlu0 %2255 }
0x1326   : > { %v2258_v24 = vmul.f32 0.03125, %v2256_v23  ;;  %v2261_v26 = vmul.f32 %v2259_v8, %v2259_v8 }
0x1328   : > { %v2260_v27 = vsub.f32 %v2242_v20, %v2258_v24  ;;  %v2263_v10 = vsel %vm914_vm4, %v2261_v26, 0.0 }
0x1329   : > { %2264 = vadd.xlane.f32.xlu1 %v2263_v10 }
0x132a   : > { %v2262_v61 = vmul.f32 %v2260_v27, %v2260_v27 }
0x132c   : > { %v2266_v30 = vsel %vm914_vm4, %v2262_v61, 0.0 }
0x132d   : > { %2267 = vadd.xlane.f32.xlu1 %v2266_v30 }
0x13b6   : > { %v2265_v36 = vpop.xlane.xlu1 %2264 }
0x13b7   : > { %v2269_v37 = vmul.f32 0.03125, %v2265_v36 }
0x13b9   : > { %v2271_v38 = vadd.f32 1e-05, %v2269_v37 }
0x13ba   : > { %v2268_v39 = vpop.xlane.xlu1 %2267 }
0x13bb   : > { %2975 = vrsqrt.f32 %v2271_v38  ;;  %v2270_v43 = vmul.f32 0.03125, %v2268_v39 }
0x13bd   : > { %v2272_v41 = vadd.f32 1e-05, %v2270_v43 }
0x13bf   : > { %2977 = vrsqrt.f32 %v2272_v41 }
0x13c5   : > { %v2976_v28 = vpop.eup %2975 }
0x13c6   : > { %v2275_v46 = vmul.f32 %v2976_v28, %v2259_v8 }
0x13c8   : > { %v2281_v48 = vmul.f32 %v2591_v35, %v2275_v46 }
0x13c9   : > { %v2978_v44 = vpop.eup %2977 }
0x13ca   : > { %v2276_v47 = vmul.f32 %v2978_v44, %v2260_v27  ;;  %v2287_v54 = vadd.f32 %v2592_v49, %v2281_v48 }
0x13cc   : > { %v2282_v53 = vmul.f32 %v2591_v35, %v2276_v47 }
0x13ce   : > { %v2288_v55 = vadd.f32 %v2592_v49, %v2282_v53 }
0x13d0   : > { %v2289_v57 = vpack.c.bf16 %v2288_v55, %v2287_v54 }
0x13d2   : > { %2804 = vmatmul.mubr.msk.bf16.vlgmr.msra.gmra.mrb[0].mxu0 %vm914_vm4, %v2289_v57 }
0x14a5   : > { %v2343_v60 = vpop.f32.mrb[0].mxu0 }
0x14a6   : > { %2350 = vst.msk [vmem:[#allocation3] sm:$0xff] %vm1939_vm9, %v2343_v60  ;;  %v2805_v62 = vpop.f32.mrb[1].mxu0 }
0x14a7   : > { %v2346_v63 = vpop.f32.mrb[2].mxu0 }
0x14a8   : > { %2351 = vst.msk [vmem:[#allocation3 + $0x8] sm:$0xff] %vm1939_vm9, %v2346_v63  ;;  %v2806_v1 = vpop.f32.mrb[3].mxu0 }
0x14a9 PF: > { %s3711_s12 = sadd.s32 4294967295, %s3061_s27   ;;  %s3082_s30 = smov [#allocation3]  }
0x14aa   : > { %p3630_p7 = scmp.eq.s32.totalorder %s3711_s12, 1  ;;  %s2366_s15 = sshll.u32 %s3082_s30, 4  ;;  %s2367_s15 = int_to_ptr.vmem [resolvable:$true] %s2366_s15 }
0x14ab   : > { %s3083_s20 = smov [#allocation5]   ;;  %s2979_s23 = scalar_lea.vmem %s2367_s15, 256 }
0x14ac   : > { %s2382_s22 = sshll.u32 %s3083_s20, 4  ;;  %p2980_p8 = scmp.ne.s32.totalorder %s2367_s15, %s2979_s23  ;;  %s2383_s22 = int_to_ptr.vmem [resolvable:$true] %s2382_s22 }
0x14ad   : > { %p2986_p11 = scmp.lt.s32.totalorder %s2367_s15, %s2367_s15  ;;  %p2987_p12 = scmp.lt.s32.totalorder %s2979_s23, %s2979_s23 }
0x14ae   : > { %p2981_p9 = pnand %p2980_p8, %p3630_p7 }
0x14af   : > { %p2988_p13 = por %p2987_p12, %p2986_p11 }
0x14b0   : > { %p2982_p10 = pneg %p2981_p9 }
0x14b2   : > { %p2989_p0 = pnand %p2988_p13, %p2982_p10 }
0x14b4   : > { %2992 = shalt.err (!%p2989_p0)
}
0x14b5   : > { %s3713_s26 = sld [smem:[#allocation11_spill]] }
0x14bb   : > { %s3714_s24 = smov %s3713_s26  ;;  %s2993_s14 = scalar_lea.hbm %s3713_s26, 256 }
0x14bc   : > { %p2994_p1 = scmp.ne.s32.totalorder %s3714_s24, %s2993_s14  ;;  %p2999_p4 = scmp.lt.u32.totalorder %s2993_s14, %s3714_s24 }
0x14be   : > { %p2995_p2 = pnand %p2994_p1, %p3630_p7 }
0x14c0   : > { %p2996_p3 = pneg %p2995_p2 }
0x14c2   : > { %p3001_p5 = pnand %p2999_p4, %p2996_p3 }
0x14c4   : > { %3004 = shalt.err (!%p3001_p5)
}
0x14c5   : > { %s3084_s12 = smov 128   ;;  %s3005_s23 = scalar_lea.vmem %s2383_s22, 32 }
0x14c6   : > { %2808 = dma.vmem_to_hbm [thread:$0]  (%p3630_p7), %s2367_s15, 256, %s3714_s24, [#allocation4], %s3084_s12, %s3084_s12, %s3077_s16  }
0x14c7   : > { %p3006_p6 = scmp.ne.s32.totalorder %s2383_s22, %s3005_s23  ;;  %p3012_p10 = scmp.lt.s32.totalorder %s2383_s22, %s2383_s22 }
0x14c8   : > { %p3013_p11 = scmp.lt.s32.totalorder %s3005_s23, %s3005_s23 }
0x14c9   : > { %p3007_p8 = pnand %p3006_p6, %p3630_p7 }
0x14ca   : > { %p3014_p12 = por %p3013_p11, %p3012_p10 }
0x14cb   : > { %p3008_p9 = pneg %p3007_p8 }
0x14cd   : > { %p3015_p13 = pnand %p3014_p12, %p3008_p9 }
0x14cf   : > { %3018 = shalt.err (!%p3015_p13)
}
0x14d0   : > { %s3715_s26 = sld [smem:[#allocation12_spill]] }
0x14d6   : > { %s3716_s14 = smov %s3715_s26  ;;  %s3019_s18 = scalar_lea.hbm %s3715_s26, 32 }
0x14d7   : > { %p3020_p0 = scmp.ne.s32.totalorder %s3716_s14, %s3019_s18  ;;  %p3025_p3 = scmp.lt.u32.totalorder %s3019_s18, %s3716_s14 }
0x14d9   : > { %p3021_p1 = pnand %p3020_p0, %p3630_p7 }
0x14db   : > { %p3022_p2 = pneg %p3021_p1 }
0x14dd   : > { %p3027_p4 = pnand %p3025_p3, %p3022_p2 }
0x14df   : > { %3030 = shalt.err (!%p3027_p4)
}
0x14e0   : > { %s3085_s29 = smov 1  }
0x14e1   : > { %2810 = dma.vmem_to_hbm [thread:$0]  (%p3630_p7), %s2383_s22, 32, %s3716_s14, [#allocation6], %s3078_s17, %s3078_s17, %s3085_s29  }
0x14e2   : > { %3044 = dma.done.wait (%p3630_p7), [#allocation4], 256  }
0x14e3   : > { %3046 = vsyncadd (%p3630_p7), [#allocation4], 4294967040 }
0x14e4   : > { %3048 = dma.done.wait (%p3630_p7), [#allocation6], 32  }
0x14e5   : > { %3050 = vsyncadd (%p3630_p7), [#allocation6], 4294967264 }
0x14e6 PF: > { %s26_s27 = sadd.s32 1, %s3061_s27   ;;  %s3717_s25 = sld [smem:[#allocation9_spill]] }
0x14e7   : > { %p23_p5 = scmp.ge.s32.totalorder %s26_s27, 4   ;;  %s3718_s26 = sld [smem:[#allocation10_spill]] }
0x14e9   :  { %25 = sbr.rel (!%p23_p5) target bundleno = 6 (0x6), region = 130 }
0x14f0   :  { %2402 = vsyncpa [#allocation4], 1 }
0x14f1   :  { %2404 = vsyncpa [#allocation4 + $0x1], 1 }
0x14f2   :  { %2405 = vsyncpa [#allocation6], 1 }

</bundles_post_ra>
